<compile_context>
chip_gen: v7x
topology: tpu7x:2x2x1
jax: 0.10.0
libtpu: 0.0.40
codegen_flags: <defaults>
</compile_context>

<pallas_src>
import math

import jax
import jax.numpy as jnp
from jax.experimental import pallas as pl
from jax.experimental.pallas import tpu as pltpu

KSIZE = 3
LRELU_SLOPE = 0.01      # torch.nn.LeakyReLU default
LANE = 128              # lane-tile stride used for the flatten scatter


# ---------------------------------------------------------------------------
# Kernel: one batch-chunk per grid step, everything resident in VMEM.
# ---------------------------------------------------------------------------
def model1_kernel(x_ref,                    # (L0*bc, Cin)  rows = t*bc + j
                  w1_ref, b1_ref,           # (3, Cin, 50), (1, 50)
                  w2_ref, b2_ref,           # (3, 50, 50),  (1, 50)
                  w3_ref, b3_ref,           # (3, 50, 50),  (1, 50)
                  wl_ref, bl_ref,           # (Lf*128, nCh), (1, nCh)
                  out_ref,                  # (bc, nCh)
                  h1_ref, h2_ref, h3_ref,   # conv scratch, channels on lanes
                  hflat_ref):               # (bc, Lf*128)
    bc = out_ref.shape[0]
    cmid = w1_ref.shape[2]                  # 50

    def conv_lrelu(tap, n_rows, w_ref, b_ref):
        # Conv1d(k=3, VALID) as 3 whole-chunk matmuls (batch folded into M).
        acc = jnp.dot(tap(0, n_rows), w_ref[0],
                      preferred_element_type=jnp.float32) + b_ref[...]
        for k in range(1, KSIZE):
            acc = acc + jnp.dot(tap(k, n_rows), w_ref[k],
                                preferred_element_type=jnp.float32)
        return jnp.where(acc > 0, acc, jnp.float32(LRELU_SLOPE) * acc)

    h1_ref[...] = conv_lrelu(lambda k, n: x_ref[pl.ds(k * bc, n), :],
                             h1_ref.shape[0], w1_ref, b1_ref)
    h2_ref[...] = conv_lrelu(lambda k, n: h1_ref[pl.ds(k * bc, n), :],
                             h2_ref.shape[0], w2_ref, b2_ref)
    h3_ref[...] = conv_lrelu(lambda k, n: h2_ref[pl.ds(k * bc, n), :],
                             h3_ref.shape[0], w3_ref, b3_ref)

    # Flatten (channel-major, matching torch.nn.Flatten on (B,50,Lf)): scatter
    # each time step's (bc, 50) block into its own 128-lane-aligned slot.  The
    # linear weight was zero-padded offline to the same (Lf*128, nCh) layout.
    hflat_ref[...] = jnp.zeros_like(hflat_ref)
    lf = h3_ref.shape[0] // bc
    for t in range(lf):
        hflat_ref[:, t * LANE: t * LANE + cmid] = h3_ref[pl.ds(t * bc, bc), :]

    # Single (bc, Lf*128) @ (Lf*128, nCh) matmul for Flatten+Linear.
    y = jnp.dot(hflat_ref[...], wl_ref[...],
                preferred_element_type=jnp.float32) + bl_ref[...]
    out_ref[...] = y.astype(out_ref.dtype)


# ---------------------------------------------------------------------------
# One-time parameter prep (hoisted out of the per-call path).
# ---------------------------------------------------------------------------
def prepare_params(params):
    nCh = params["wl"].shape[0]
    cmid = params["w1"].shape[0]                       # 50
    lf = params["wl"].shape[1] // cmid                 # 14

    def conv_w(w):                                     # (50, Cin, 3) -> (3, Cin, 50)
        return jnp.transpose(w, (2, 1, 0)).astype(jnp.float32)

    # torch Flatten index = c*Lf + t  ->  wlin[t, c, n] = WL[n, c*Lf + t]
    wlin = jnp.transpose(params["wl"].reshape(nCh, cmid, lf), (2, 1, 0))
    # pad each per-time-step (50, nCh) slab to 128 rows (zeros) so the kernel
    # can scatter activations at lane-tile-aligned offsets.
    wlin = jnp.pad(wlin, ((0, 0), (0, LANE - cmid), (0, 0)))
    wlin = wlin.reshape(lf * LANE, nCh).astype(jnp.float32)

    f32 = lambda a: a.astype(jnp.float32)
    return {
        "w1t": conv_w(params["w1"]), "b1": f32(params["b1"]).reshape(1, -1),
        "w2t": conv_w(params["w2"]), "b2": f32(params["b2"]).reshape(1, -1),
        "w3t": conv_w(params["w3"]), "b3": f32(params["b3"]).reshape(1, -1),
        "wl": wlin, "bl": f32(params["bl"]).reshape(1, -1),
    }


# ---------------------------------------------------------------------------
# Forward wrapper: activation layout + pallas_call.
# ---------------------------------------------------------------------------
def model1_forward(x, prepped, *, batch_chunk=None):
    """x: (B, nChannel, numSampleInput) float32 (NCL, like PyTorch)."""
    B, cin, L0 = x.shape
    cmid = prepped["w1t"].shape[2]
    nCh = prepped["bl"].shape[1]
    lf = prepped["wl"].shape[0] // LANE
    assert L0 - 3 * (KSIZE - 1) == lf, "input length inconsistent with Linear(700,.)"

    bc = batch_chunk if batch_chunk is not None else min(B, 8)
    assert B % bc == 0, "batch must be divisible by batch_chunk"
    nchunks = B // bc
    l1, l2 = L0 - 2, L0 - 4

    # Per chunk: rows = (time t)*bc + (elem j), channels on lanes.
    xt = jnp.transpose(x.astype(jnp.float32), (0, 2, 1))           # (B, L0, Cin)
    xt = xt.reshape(nchunks, bc, L0, cin).transpose(0, 2, 1, 3)    # (nc, L0, bc, Cin)
    xt = xt.reshape(nchunks, L0 * bc, cin)

    args = (xt, prepped["w1t"], prepped["b1"], prepped["w2t"], prepped["b2"],
            prepped["w3t"], prepped["b3"], prepped["wl"], prepped["bl"])

    def full_spec(a):
        return pl.BlockSpec(a.shape, lambda i: (0,) * a.ndim)

    in_specs = [pl.BlockSpec((None, L0 * bc, cin), lambda i: (i, 0, 0))]
    in_specs += [full_spec(a) for a in args[1:]]

    out = pl.pallas_call(
        model1_kernel,
        out_shape=jax.ShapeDtypeStruct((nchunks, bc, nCh), jnp.float32),
        grid_spec=pltpu.PrefetchScalarGridSpec(
            num_scalar_prefetch=0,
            grid=(nchunks,),
            in_specs=in_specs,
            out_specs=pl.BlockSpec((None, bc, nCh), lambda i: (i, 0, 0)),
            scratch_shapes=[
                pltpu.VMEM((l1 * bc, cmid), jnp.float32),
                pltpu.VMEM((l2 * bc, cmid), jnp.float32),
                pltpu.VMEM((lf * bc, cmid), jnp.float32),
                pltpu.VMEM((bc, lf * LANE), jnp.float32),
            ]),
        compiler_params=pltpu.CompilerParams(
            dimension_semantics=("parallel",)),
    )(*args)
    return out.reshape(B, nCh)


# ---------------------------------------------------------------------------
# Pure-JAX reference (mirrors the PyTorch forward) for validation.
# ---------------------------------------------------------------------------
def ref_forward(x, params):
    def conv1d(h, w, b):
        y = jax.lax.conv_general_dilated(
            h, w, window_strides=(1,), padding="VALID",
            dimension_numbers=("NCH", "OIH", "NCH"))
        return y + b[None, :, None]

    def lrelu(v):
        return jnp.where(v > 0, v, LRELU_SLOPE * v)

    h = lrelu(conv1d(x, params["w1"], params["b1"]))
    h = lrelu(conv1d(h, params["w2"], params["b2"]))
    h = lrelu(conv1d(h, params["w3"], params["b3"]))
    flat = h.reshape(h.shape[0], -1)          # channel-major flatten (like torch)
    return flat @ params["wl"].T + params["bl"]


# ---------------------------------------------------------------------------
# Deterministic parameter init (xavier_uniform weights, small uniform biases).
# ---------------------------------------------------------------------------
def xavier_uniform(key, shape, fan_in, fan_out):
    bound = math.sqrt(6.0 / (fan_in + fan_out))
    return jax.random.uniform(key, shape, jnp.float32, -bound, bound)


def init_params(key, nChannel, numSampleInput):
    lf = numSampleInput - 3 * (KSIZE - 1)
    keys = jax.random.split(key, 8)
    p = {}
    p["w1"] = xavier_uniform(keys[0], (50, nChannel, KSIZE),
                             nChannel * KSIZE, 50 * KSIZE)
    p["b1"] = jax.random.uniform(keys[1], (50,), jnp.float32, -0.1, 0.1)
    p["w2"] = xavier_uniform(keys[2], (50, 50, KSIZE), 50 * KSIZE, 50 * KSIZE)
    p["b2"] = jax.random.uniform(keys[3], (50,), jnp.float32, -0.1, 0.1)
    p["w3"] = xavier_uniform(keys[4], (50, 50, KSIZE), 50 * KSIZE, 50 * KSIZE)
    p["b3"] = jax.random.uniform(keys[5], (50,), jnp.float32, -0.1, 0.1)
    p["wl"] = xavier_uniform(keys[6], (nChannel, 50 * lf), 50 * lf, nChannel)
    p["bl"] = jax.random.uniform(keys[7], (nChannel,), jnp.float32, -0.1, 0.1)
    return p


if __name__ == "__main__":
    nChannel = 4
    numSampleInput = 20          # implied by Linear(700, nChannel): 700 = 50*(L-6)
    batch = 2

    key = jax.random.PRNGKey(0)
    k_param, k_x = jax.random.split(key)
    params = init_params(k_param, nChannel, numSampleInput)
    x = jax.random.normal(k_x, (batch, nChannel, numSampleInput), jnp.float32)

    prepped = prepare_params(params)       # one-time weight layout prep
    ref = ref_forward(x, params)

    # Whole batch folded into one grid step (M = batch*L per conv matmul).
    out = jax.block_until_ready(model1_forward(x, prepped, batch_chunk=batch))
    assert out.shape == (batch, nChannel), out.shape
    if not jnp.allclose(out, ref, atol=1e-4, rtol=1e-4):
        raise RuntimeError("mismatch (batch_chunk=batch): max err "
                           f"{float(jnp.max(jnp.abs(out - ref)))}")

    # Chunked grid (one element per step; 'parallel' lets v7x's two TensorCores
    # split the batch).  Same numerics, exercised here for coverage.
    out2 = jax.block_until_ready(model1_forward(x, prepped, batch_chunk=1))
    if not jnp.allclose(out2, ref, atol=1e-4, rtol=1e-4):
        raise RuntimeError("mismatch (batch_chunk=1): max err "
                           f"{float(jnp.max(jnp.abs(out2 - ref)))}")

    print("KERNEL_OK")
</pallas_src>

<mosaic_0001>
module attributes {stable_mosaic.version = 11 : i64} {
  func.func @model1_kernel(%arg0: i32, %arg1: memref<1x40x4xf32, #tpu.memory_space<vmem>>, %arg2: memref<3x4x50xf32, #tpu.memory_space<vmem>>, %arg3: memref<1x50xf32, #tpu.memory_space<vmem>>, %arg4: memref<3x50x50xf32, #tpu.memory_space<vmem>>, %arg5: memref<1x50xf32, #tpu.memory_space<vmem>>, %arg6: memref<3x50x50xf32, #tpu.memory_space<vmem>>, %arg7: memref<1x50xf32, #tpu.memory_space<vmem>>, %arg8: memref<1792x4xf32, #tpu.memory_space<vmem>>, %arg9: memref<1x4xf32, #tpu.memory_space<vmem>>, %arg10: memref<1x2x4xf32, #tpu.memory_space<vmem>>, %arg11: memref<36x50xf32, #tpu.memory_space<vmem>>, %arg12: memref<32x50xf32, #tpu.memory_space<vmem>>, %arg13: memref<28x50xf32, #tpu.memory_space<vmem>>, %arg14: memref<2x1792xf32, #tpu.memory_space<vmem>>) attributes {dimension_semantics = [#tpu.dimension_semantics<parallel>], iteration_bounds = array<i64: 1>, scalar_prefetch = 0 : i64, scratch_operands = 4 : i64, tpu.core_type = #tpu.core_type<tc>, window_params = [{transform_indices = @transform_0, window_bounds = array<i64: 1, 40, 4>}, {pipeline_mode = #tpu.pipeline_mode<synchronous>, transform_indices = @transform_1, window_bounds = array<i64: 3, 4, 50>}, {pipeline_mode = #tpu.pipeline_mode<synchronous>, transform_indices = @transform_2, window_bounds = array<i64: 1, 50>}, {pipeline_mode = #tpu.pipeline_mode<synchronous>, transform_indices = @transform_3, window_bounds = array<i64: 3, 50, 50>}, {pipeline_mode = #tpu.pipeline_mode<synchronous>, transform_indices = @transform_4, window_bounds = array<i64: 1, 50>}, {pipeline_mode = #tpu.pipeline_mode<synchronous>, transform_indices = @transform_5, window_bounds = array<i64: 3, 50, 50>}, {pipeline_mode = #tpu.pipeline_mode<synchronous>, transform_indices = @transform_6, window_bounds = array<i64: 1, 50>}, {pipeline_mode = #tpu.pipeline_mode<synchronous>, transform_indices = @transform_7, window_bounds = array<i64: 1792, 4>}, {pipeline_mode = #tpu.pipeline_mode<synchronous>, transform_indices = @transform_8, window_bounds = array<i64: 1, 4>}, {transform_indices = @transform_9, window_bounds = array<i64: 1, 2, 4>}]} {
    %c0 = arith.constant 0 : index
    %c0_0 = arith.constant 0 : index
    %c0_1 = arith.constant 0 : index
    %0 = vector.load %arg1[%c0, %c0_0, %c0_1] : memref<1x40x4xf32, #tpu.memory_space<vmem>>, vector<1x36x4xf32>
    %1 = vector.shape_cast %0 : vector<1x36x4xf32> to vector<36x4xf32>
    %c0_2 = arith.constant 0 : index
    %c0_3 = arith.constant 0 : index
    %c0_4 = arith.constant 0 : index
    %2 = vector.load %arg2[%c0_2, %c0_3, %c0_4] : memref<3x4x50xf32, #tpu.memory_space<vmem>>, vector<1x4x50xf32>
    %3 = vector.shape_cast %2 : vector<1x4x50xf32> to vector<4x50xf32>
    %cst = arith.constant dense<0.000000e+00> : vector<36x50xf32>
    %4 = tpu.matmul %1, %3, %cst {dimension_numbers = #tpu.dot_dimension_numbers<[1], [0], [0], [1], [0, 0, 1, 1], [], []>} : vector<36x4xf32>, vector<4x50xf32>, vector<36x50xf32> -> vector<36x50xf32>
    %c0_5 = arith.constant 0 : index
    %c0_6 = arith.constant 0 : index
    %5 = vector.load %arg3[%c0_5, %c0_6] : memref<1x50xf32, #tpu.memory_space<vmem>>, vector<1x50xf32>
    %6 = vector.broadcast %5 : vector<1x50xf32> to vector<36x50xf32>
    %7 = arith.addf %4, %6 : vector<36x50xf32>
    %c0_7 = arith.constant 0 : index
    %c2 = arith.constant 2 : index
    %c0_8 = arith.constant 0 : index
    %8 = vector.load %arg1[%c0_7, %c2, %c0_8] : memref<1x40x4xf32, #tpu.memory_space<vmem>>, vector<1x36x4xf32>
    %9 = vector.shape_cast %8 : vector<1x36x4xf32> to vector<36x4xf32>
    %c1 = arith.constant 1 : index
    %c0_9 = arith.constant 0 : index
    %c0_10 = arith.constant 0 : index
    %10 = vector.load %arg2[%c1, %c0_9, %c0_10] : memref<3x4x50xf32, #tpu.memory_space<vmem>>, vector<1x4x50xf32>
    %11 = vector.shape_cast %10 : vector<1x4x50xf32> to vector<4x50xf32>
    %cst_11 = arith.constant dense<0.000000e+00> : vector<36x50xf32>
    %12 = tpu.matmul %9, %11, %cst_11 {dimension_numbers = #tpu.dot_dimension_numbers<[1], [0], [0], [1], [0, 0, 1, 1], [], []>} : vector<36x4xf32>, vector<4x50xf32>, vector<36x50xf32> -> vector<36x50xf32>
    %13 = arith.addf %7, %12 : vector<36x50xf32>
    %c0_12 = arith.constant 0 : index
    %c4 = arith.constant 4 : index
    %c0_13 = arith.constant 0 : index
    %14 = vector.load %arg1[%c0_12, %c4, %c0_13] : memref<1x40x4xf32, #tpu.memory_space<vmem>>, vector<1x36x4xf32>
    %15 = vector.shape_cast %14 : vector<1x36x4xf32> to vector<36x4xf32>
    %c2_14 = arith.constant 2 : index
    %c0_15 = arith.constant 0 : index
    %c0_16 = arith.constant 0 : index
    %16 = vector.load %arg2[%c2_14, %c0_15, %c0_16] : memref<3x4x50xf32, #tpu.memory_space<vmem>>, vector<1x4x50xf32>
    %17 = vector.shape_cast %16 : vector<1x4x50xf32> to vector<4x50xf32>
    %cst_17 = arith.constant dense<0.000000e+00> : vector<36x50xf32>
    %18 = tpu.matmul %15, %17, %cst_17 {dimension_numbers = #tpu.dot_dimension_numbers<[1], [0], [0], [1], [0, 0, 1, 1], [], []>} : vector<36x4xf32>, vector<4x50xf32>, vector<36x50xf32> -> vector<36x50xf32>
    %19 = arith.addf %13, %18 : vector<36x50xf32>
    %cst_18 = arith.constant 0.000000e+00 : f32
    %20 = vector.broadcast %cst_18 : f32 to vector<36x50xf32>
    %21 = arith.cmpf ogt, %19, %20 : vector<36x50xf32>
    %cst_19 = arith.constant 0.00999999977 : f32
    %22 = vector.broadcast %cst_19 : f32 to vector<36x50xf32>
    %23 = arith.mulf %22, %19 : vector<36x50xf32>
    %24 = arith.select %21, %19, %23 : vector<36x50xi1>, vector<36x50xf32>
    %c0_20 = arith.constant 0 : index
    %c0_21 = arith.constant 0 : index
    %25 = vector.load %arg11[%c0_20, %c0_21] : memref<36x50xf32, #tpu.memory_space<vmem>>, vector<36x50xf32>
    tpu.vector_store %arg11[%c0_20, %c0_21], %24 {strides = array<i32>} : memref<36x50xf32, #tpu.memory_space<vmem>>, vector<36x50xf32>,
    %c0_22 = arith.constant 0 : index
    %c0_23 = arith.constant 0 : index
    %26 = vector.load %arg11[%c0_22, %c0_23] : memref<36x50xf32, #tpu.memory_space<vmem>>, vector<32x50xf32>
    %c0_24 = arith.constant 0 : index
    %c0_25 = arith.constant 0 : index
    %c0_26 = arith.constant 0 : index
    %27 = vector.load %arg4[%c0_24, %c0_25, %c0_26] : memref<3x50x50xf32, #tpu.memory_space<vmem>>, vector<1x50x50xf32>
    %28 = vector.shape_cast %27 : vector<1x50x50xf32> to vector<50x50xf32>
    %cst_27 = arith.constant dense<0.000000e+00> : vector<32x50xf32>
    %29 = tpu.matmul %26, %28, %cst_27 {dimension_numbers = #tpu.dot_dimension_numbers<[1], [0], [0], [1], [0, 0, 1, 1], [], []>} : vector<32x50xf32>, vector<50x50xf32>, vector<32x50xf32> -> vector<32x50xf32>
    %c0_28 = arith.constant 0 : index
    %c0_29 = arith.constant 0 : index
    %30 = vector.load %arg5[%c0_28, %c0_29] : memref<1x50xf32, #tpu.memory_space<vmem>>, vector<1x50xf32>
    %31 = vector.broadcast %30 : vector<1x50xf32> to vector<32x50xf32>
    %32 = arith.addf %29, %31 : vector<32x50xf32>
    %c2_30 = arith.constant 2 : index
    %c0_31 = arith.constant 0 : index
    %33 = vector.load %arg11[%c2_30, %c0_31] : memref<36x50xf32, #tpu.memory_space<vmem>>, vector<32x50xf32>
    %c1_32 = arith.constant 1 : index
    %c0_33 = arith.constant 0 : index
    %c0_34 = arith.constant 0 : index
    %34 = vector.load %arg4[%c1_32, %c0_33, %c0_34] : memref<3x50x50xf32, #tpu.memory_space<vmem>>, vector<1x50x50xf32>
    %35 = vector.shape_cast %34 : vector<1x50x50xf32> to vector<50x50xf32>
    %cst_35 = arith.constant dense<0.000000e+00> : vector<32x50xf32>
    %36 = tpu.matmul %33, %35, %cst_35 {dimension_numbers = #tpu.dot_dimension_numbers<[1], [0], [0], [1], [0, 0, 1, 1], [], []>} : vector<32x50xf32>, vector<50x50xf32>, vector<32x50xf32> -> vector<32x50xf32>
    %37 = arith.addf %32, %36 : vector<32x50xf32>
    %c4_36 = arith.constant 4 : index
    %c0_37 = arith.constant 0 : index
    %38 = vector.load %arg11[%c4_36, %c0_37] : memref<36x50xf32, #tpu.memory_space<vmem>>, vector<32x50xf32>
    %c2_38 = arith.constant 2 : index
    %c0_39 = arith.constant 0 : index
    %c0_40 = arith.constant 0 : index
    %39 = vector.load %arg4[%c2_38, %c0_39, %c0_40] : memref<3x50x50xf32, #tpu.memory_space<vmem>>, vector<1x50x50xf32>
    %40 = vector.shape_cast %39 : vector<1x50x50xf32> to vector<50x50xf32>
    %cst_41 = arith.constant dense<0.000000e+00> : vector<32x50xf32>
    %41 = tpu.matmul %38, %40, %cst_41 {dimension_numbers = #tpu.dot_dimension_numbers<[1], [0], [0], [1], [0, 0, 1, 1], [], []>} : vector<32x50xf32>, vector<50x50xf32>, vector<32x50xf32> -> vector<32x50xf32>
    %42 = arith.addf %37, %41 : vector<32x50xf32>
    %cst_42 = arith.constant 0.000000e+00 : f32
    %43 = vector.broadcast %cst_42 : f32 to vector<32x50xf32>
    %44 = arith.cmpf ogt, %42, %43 : vector<32x50xf32>
    %cst_43 = arith.constant 0.00999999977 : f32
    %45 = vector.broadcast %cst_43 : f32 to vector<32x50xf32>
    %46 = arith.mulf %45, %42 : vector<32x50xf32>
    %47 = arith.select %44, %42, %46 : vector<32x50xi1>, vector<32x50xf32>
    %c0_44 = arith.constant 0 : index
    %c0_45 = arith.constant 0 : index
    %48 = vector.load %arg12[%c0_44, %c0_45] : memref<32x50xf32, #tpu.memory_space<vmem>>, vector<32x50xf32>
    tpu.vector_store %arg12[%c0_44, %c0_45], %47 {strides = array<i32>} : memref<32x50xf32, #tpu.memory_space<vmem>>, vector<32x50xf32>,
    %c0_46 = arith.constant 0 : index
    %c0_47 = arith.constant 0 : index
    %49 = vector.load %arg12[%c0_46, %c0_47] : memref<32x50xf32, #tpu.memory_space<vmem>>, vector<28x50xf32>
    %c0_48 = arith.constant 0 : index
    %c0_49 = arith.constant 0 : index
    %c0_50 = arith.constant 0 : index
    %50 = vector.load %arg6[%c0_48, %c0_49, %c0_50] : memref<3x50x50xf32, #tpu.memory_space<vmem>>, vector<1x50x50xf32>
    %51 = vector.shape_cast %50 : vector<1x50x50xf32> to vector<50x50xf32>
    %cst_51 = arith.constant dense<0.000000e+00> : vector<28x50xf32>
    %52 = tpu.matmul %49, %51, %cst_51 {dimension_numbers = #tpu.dot_dimension_numbers<[1], [0], [0], [1], [0, 0, 1, 1], [], []>} : vector<28x50xf32>, vector<50x50xf32>, vector<28x50xf32> -> vector<28x50xf32>
    %c0_52 = arith.constant 0 : index
    %c0_53 = arith.constant 0 : index
    %53 = vector.load %arg7[%c0_52, %c0_53] : memref<1x50xf32, #tpu.memory_space<vmem>>, vector<1x50xf32>
    %54 = vector.broadcast %53 : vector<1x50xf32> to vector<28x50xf32>
    %55 = arith.addf %52, %54 : vector<28x50xf32>
    %c2_54 = arith.constant 2 : index
    %c0_55 = arith.constant 0 : index
    %56 = vector.load %arg12[%c2_54, %c0_55] : memref<32x50xf32, #tpu.memory_space<vmem>>, vector<28x50xf32>
    %c1_56 = arith.constant 1 : index
    %c0_57 = arith.constant 0 : index
    %c0_58 = arith.constant 0 : index
    %57 = vector.load %arg6[%c1_56, %c0_57, %c0_58] : memref<3x50x50xf32, #tpu.memory_space<vmem>>, vector<1x50x50xf32>
    %58 = vector.shape_cast %57 : vector<1x50x50xf32> to vector<50x50xf32>
    %cst_59 = arith.constant dense<0.000000e+00> : vector<28x50xf32>
    %59 = tpu.matmul %56, %58, %cst_59 {dimension_numbers = #tpu.dot_dimension_numbers<[1], [0], [0], [1], [0, 0, 1, 1], [], []>} : vector<28x50xf32>, vector<50x50xf32>, vector<28x50xf32> -> vector<28x50xf32>
    %60 = arith.addf %55, %59 : vector<28x50xf32>
    %c4_60 = arith.constant 4 : index
    %c0_61 = arith.constant 0 : index
    %61 = vector.load %arg12[%c4_60, %c0_61] : memref<32x50xf32, #tpu.memory_space<vmem>>, vector<28x50xf32>
    %c2_62 = arith.constant 2 : index
    %c0_63 = arith.constant 0 : index
    %c0_64 = arith.constant 0 : index
    %62 = vector.load %arg6[%c2_62, %c0_63, %c0_64] : memref<3x50x50xf32, #tpu.memory_space<vmem>>, vector<1x50x50xf32>
    %63 = vector.shape_cast %62 : vector<1x50x50xf32> to vector<50x50xf32>
    %cst_65 = arith.constant dense<0.000000e+00> : vector<28x50xf32>
    %64 = tpu.matmul %61, %63, %cst_65 {dimension_numbers = #tpu.dot_dimension_numbers<[1], [0], [0], [1], [0, 0, 1, 1], [], []>} : vector<28x50xf32>, vector<50x50xf32>, vector<28x50xf32> -> vector<28x50xf32>
    %65 = arith.addf %60, %64 : vector<28x50xf32>
    %cst_66 = arith.constant 0.000000e+00 : f32
    %66 = vector.broadcast %cst_66 : f32 to vector<28x50xf32>
    %67 = arith.cmpf ogt, %65, %66 : vector<28x50xf32>
    %cst_67 = arith.constant 0.00999999977 : f32
    %68 = vector.broadcast %cst_67 : f32 to vector<28x50xf32>
    %69 = arith.mulf %68, %65 : vector<28x50xf32>
    %70 = arith.select %67, %65, %69 : vector<28x50xi1>, vector<28x50xf32>
    %c0_68 = arith.constant 0 : index
    %c0_69 = arith.constant 0 : index
    %71 = vector.load %arg13[%c0_68, %c0_69] : memref<28x50xf32, #tpu.memory_space<vmem>>, vector<28x50xf32>
    tpu.vector_store %arg13[%c0_68, %c0_69], %70 {strides = array<i32>} : memref<28x50xf32, #tpu.memory_space<vmem>>, vector<28x50xf32>,
    %cst_70 = arith.constant 0.000000e+00 : f32
    %72 = vector.broadcast %cst_70 : f32 to vector<2x1792xf32>
    %c0_71 = arith.constant 0 : index
    %c0_72 = arith.constant 0 : index
    %73 = vector.load %arg14[%c0_71, %c0_72] : memref<2x1792xf32, #tpu.memory_space<vmem>>, vector<2x1792xf32>
    tpu.vector_store %arg14[%c0_71, %c0_72], %72 {strides = array<i32>} : memref<2x1792xf32, #tpu.memory_space<vmem>>, vector<2x1792xf32>,
    %c0_73 = arith.constant 0 : index
    %c0_74 = arith.constant 0 : index
    %74 = vector.load %arg13[%c0_73, %c0_74] : memref<28x50xf32, #tpu.memory_space<vmem>>, vector<2x50xf32>
    %c0_75 = arith.constant 0 : index
    %c0_76 = arith.constant 0 : index
    %75 = vector.load %arg14[%c0_75, %c0_76] : memref<2x1792xf32, #tpu.memory_space<vmem>>, vector<2x50xf32>
    tpu.vector_store %arg14[%c0_75, %c0_76], %74 {strides = array<i32>} : memref<2x1792xf32, #tpu.memory_space<vmem>>, vector<2x50xf32>,
    %c2_77 = arith.constant 2 : index
    %c0_78 = arith.constant 0 : index
    %76 = vector.load %arg13[%c2_77, %c0_78] : memref<28x50xf32, #tpu.memory_space<vmem>>, vector<2x50xf32>
    %c0_79 = arith.constant 0 : index
    %c128 = arith.constant 128 : index
    %77 = vector.load %arg14[%c0_79, %c128] : memref<2x1792xf32, #tpu.memory_space<vmem>>, vector<2x50xf32>
    tpu.vector_store %arg14[%c0_79, %c128], %76 {strides = array<i32>} : memref<2x1792xf32, #tpu.memory_space<vmem>>, vector<2x50xf32>,
    %c4_80 = arith.constant 4 : index
    %c0_81 = arith.constant 0 : index
    %78 = vector.load %arg13[%c4_80, %c0_81] : memref<28x50xf32, #tpu.memory_space<vmem>>, vector<2x50xf32>
    %c0_82 = arith.constant 0 : index
    %c256 = arith.constant 256 : index
    %79 = vector.load %arg14[%c0_82, %c256] : memref<2x1792xf32, #tpu.memory_space<vmem>>, vector<2x50xf32>
    tpu.vector_store %arg14[%c0_82, %c256], %78 {strides = array<i32>} : memref<2x1792xf32, #tpu.memory_space<vmem>>, vector<2x50xf32>,
    %c6 = arith.constant 6 : index
    %c0_83 = arith.constant 0 : index
    %80 = vector.load %arg13[%c6, %c0_83] : memref<28x50xf32, #tpu.memory_space<vmem>>, vector<2x50xf32>
    %c0_84 = arith.constant 0 : index
    %c384 = arith.constant 384 : index
    %81 = vector.load %arg14[%c0_84, %c384] : memref<2x1792xf32, #tpu.memory_space<vmem>>, vector<2x50xf32>
    tpu.vector_store %arg14[%c0_84, %c384], %80 {strides = array<i32>} : memref<2x1792xf32, #tpu.memory_space<vmem>>, vector<2x50xf32>,
    %c8 = arith.constant 8 : index
    %c0_85 = arith.constant 0 : index
    %82 = vector.load %arg13[%c8, %c0_85] : memref<28x50xf32, #tpu.memory_space<vmem>>, vector<2x50xf32>
    %c0_86 = arith.constant 0 : index
    %c512 = arith.constant 512 : index
    %83 = vector.load %arg14[%c0_86, %c512] : memref<2x1792xf32, #tpu.memory_space<vmem>>, vector<2x50xf32>
    tpu.vector_store %arg14[%c0_86, %c512], %82 {strides = array<i32>} : memref<2x1792xf32, #tpu.memory_space<vmem>>, vector<2x50xf32>,
    %c10 = arith.constant 10 : index
    %c0_87 = arith.constant 0 : index
    %84 = vector.load %arg13[%c10, %c0_87] : memref<28x50xf32, #tpu.memory_space<vmem>>, vector<2x50xf32>
    %c0_88 = arith.constant 0 : index
    %c640 = arith.constant 640 : index
    %85 = vector.load %arg14[%c0_88, %c640] : memref<2x1792xf32, #tpu.memory_space<vmem>>, vector<2x50xf32>
    tpu.vector_store %arg14[%c0_88, %c640], %84 {strides = array<i32>} : memref<2x1792xf32, #tpu.memory_space<vmem>>, vector<2x50xf32>,
    %c12 = arith.constant 12 : index
    %c0_89 = arith.constant 0 : index
    %86 = vector.load %arg13[%c12, %c0_89] : memref<28x50xf32, #tpu.memory_space<vmem>>, vector<2x50xf32>
    %c0_90 = arith.constant 0 : index
    %c768 = arith.constant 768 : index
    %87 = vector.load %arg14[%c0_90, %c768] : memref<2x1792xf32, #tpu.memory_space<vmem>>, vector<2x50xf32>
    tpu.vector_store %arg14[%c0_90, %c768], %86 {strides = array<i32>} : memref<2x1792xf32, #tpu.memory_space<vmem>>, vector<2x50xf32>,
    %c14 = arith.constant 14 : index
    %c0_91 = arith.constant 0 : index
    %88 = vector.load %arg13[%c14, %c0_91] : memref<28x50xf32, #tpu.memory_space<vmem>>, vector<2x50xf32>
    %c0_92 = arith.constant 0 : index
    %c896 = arith.constant 896 : index
    %89 = vector.load %arg14[%c0_92, %c896] : memref<2x1792xf32, #tpu.memory_space<vmem>>, vector<2x50xf32>
    tpu.vector_store %arg14[%c0_92, %c896], %88 {strides = array<i32>} : memref<2x1792xf32, #tpu.memory_space<vmem>>, vector<2x50xf32>,
    %c16 = arith.constant 16 : index
    %c0_93 = arith.constant 0 : index
    %90 = vector.load %arg13[%c16, %c0_93] : memref<28x50xf32, #tpu.memory_space<vmem>>, vector<2x50xf32>
    %c0_94 = arith.constant 0 : index
    %c1024 = arith.constant 1024 : index
    %91 = vector.load %arg14[%c0_94, %c1024] : memref<2x1792xf32, #tpu.memory_space<vmem>>, vector<2x50xf32>
    tpu.vector_store %arg14[%c0_94, %c1024], %90 {strides = array<i32>} : memref<2x1792xf32, #tpu.memory_space<vmem>>, vector<2x50xf32>,
    %c18 = arith.constant 18 : index
    %c0_95 = arith.constant 0 : index
    %92 = vector.load %arg13[%c18, %c0_95] : memref<28x50xf32, #tpu.memory_space<vmem>>, vector<2x50xf32>
    %c0_96 = arith.constant 0 : index
    %c1152 = arith.constant 1152 : index
    %93 = vector.load %arg14[%c0_96, %c1152] : memref<2x1792xf32, #tpu.memory_space<vmem>>, vector<2x50xf32>
    tpu.vector_store %arg14[%c0_96, %c1152], %92 {strides = array<i32>} : memref<2x1792xf32, #tpu.memory_space<vmem>>, vector<2x50xf32>,
    %c20 = arith.constant 20 : index
    %c0_97 = arith.constant 0 : index
    %94 = vector.load %arg13[%c20, %c0_97] : memref<28x50xf32, #tpu.memory_space<vmem>>, vector<2x50xf32>
    %c0_98 = arith.constant 0 : index
    %c1280 = arith.constant 1280 : index
    %95 = vector.load %arg14[%c0_98, %c1280] : memref<2x1792xf32, #tpu.memory_space<vmem>>, vector<2x50xf32>
    tpu.vector_store %arg14[%c0_98, %c1280], %94 {strides = array<i32>} : memref<2x1792xf32, #tpu.memory_space<vmem>>, vector<2x50xf32>,
    %c22 = arith.constant 22 : index
    %c0_99 = arith.constant 0 : index
    %96 = vector.load %arg13[%c22, %c0_99] : memref<28x50xf32, #tpu.memory_space<vmem>>, vector<2x50xf32>
    %c0_100 = arith.constant 0 : index
    %c1408 = arith.constant 1408 : index
    %97 = vector.load %arg14[%c0_100, %c1408] : memref<2x1792xf32, #tpu.memory_space<vmem>>, vector<2x50xf32>
    tpu.vector_store %arg14[%c0_100, %c1408], %96 {strides = array<i32>} : memref<2x1792xf32, #tpu.memory_space<vmem>>, vector<2x50xf32>,
    %c24 = arith.constant 24 : index
    %c0_101 = arith.constant 0 : index
    %98 = vector.load %arg13[%c24, %c0_101] : memref<28x50xf32, #tpu.memory_space<vmem>>, vector<2x50xf32>
    %c0_102 = arith.constant 0 : index
    %c1536 = arith.constant 1536 : index
    %99 = vector.load %arg14[%c0_102, %c1536] : memref<2x1792xf32, #tpu.memory_space<vmem>>, vector<2x50xf32>
    tpu.vector_store %arg14[%c0_102, %c1536], %98 {strides = array<i32>} : memref<2x1792xf32, #tpu.memory_space<vmem>>, vector<2x50xf32>,
    %c26 = arith.constant 26 : index
    %c0_103 = arith.constant 0 : index
    %100 = vector.load %arg13[%c26, %c0_103] : memref<28x50xf32, #tpu.memory_space<vmem>>, vector<2x50xf32>
    %c0_104 = arith.constant 0 : index
    %c1664 = arith.constant 1664 : index
    %101 = vector.load %arg14[%c0_104, %c1664] : memref<2x1792xf32, #tpu.memory_space<vmem>>, vector<2x50xf32>
    tpu.vector_store %arg14[%c0_104, %c1664], %100 {strides = array<i32>} : memref<2x1792xf32, #tpu.memory_space<vmem>>, vector<2x50xf32>,
    %c0_105 = arith.constant 0 : index
    %c0_106 = arith.constant 0 : index
    %102 = vector.load %arg14[%c0_105, %c0_106] : memref<2x1792xf32, #tpu.memory_space<vmem>>, vector<2x1792xf32>
    %c0_107 = arith.constant 0 : index
    %c0_108 = arith.constant 0 : index
    %103 = vector.load %arg8[%c0_107, %c0_108] : memref<1792x4xf32, #tpu.memory_space<vmem>>, vector<1792x4xf32>
    %cst_109 = arith.constant dense<0.000000e+00> : vector<2x4xf32>
    %104 = tpu.matmul %102, %103, %cst_109 {dimension_numbers = #tpu.dot_dimension_numbers<[1], [0], [0], [1], [0, 0, 1, 1], [], []>} : vector<2x1792xf32>, vector<1792x4xf32>, vector<2x4xf32> -> vector<2x4xf32>
    %c0_110 = arith.constant 0 : index
    %c0_111 = arith.constant 0 : index
    %105 = vector.load %arg9[%c0_110, %c0_111] : memref<1x4xf32, #tpu.memory_space<vmem>>, vector<1x4xf32>
    %106 = vector.broadcast %105 : vector<1x4xf32> to vector<2x4xf32>
    %107 = arith.addf %104, %106 : vector<2x4xf32>
    %c0_112 = arith.constant 0 : index
    %c0_113 = arith.constant 0 : index
    %c0_114 = arith.constant 0 : index
    %108 = vector.load %arg10[%c0_112, %c0_113, %c0_114] : memref<1x2x4xf32, #tpu.memory_space<vmem>>, vector<1x2x4xf32>
    %109 = vector.shape_cast %108 : vector<1x2x4xf32> to vector<2x4xf32>
    %110 = vector.shape_cast %107 : vector<2x4xf32> to vector<1x2x4xf32>
    tpu.vector_store %arg10[%c0_112, %c0_113, %c0_114], %110 {strides = array<i32>} : memref<1x2x4xf32, #tpu.memory_space<vmem>>, vector<1x2x4xf32>,
    return
  }
  func.func @transform_0(%arg0: i32) -> (i32, i32, i32) {
    %c0_i32 = arith.constant 0 : i32
    %c0_i32_0 = arith.constant 0 : i32
    %c0_i32_1 = arith.constant 0 : i32
    return %arg0, %c0_i32, %c0_i32_0 : i32, i32, i32
  }
  func.func @transform_1(%arg0: i32) -> (i32, i32, i32) {
    %c0_i32 = arith.constant 0 : i32
    %c0_i32_0 = arith.constant 0 : i32
    %c0_i32_1 = arith.constant 0 : i32
    %c0_i32_2 = arith.constant 0 : i32
    return %c0_i32, %c0_i32_0, %c0_i32_1 : i32, i32, i32
  }
  func.func @transform_2(%arg0: i32) -> (i32, i32) {
    %c0_i32 = arith.constant 0 : i32
    %c0_i32_0 = arith.constant 0 : i32
    %c0_i32_1 = arith.constant 0 : i32
    return %c0_i32, %c0_i32_0 : i32, i32
  }
  func.func @transform_3(%arg0: i32) -> (i32, i32, i32) {
    %c0_i32 = arith.constant 0 : i32
    %c0_i32_0 = arith.constant 0 : i32
    %c0_i32_1 = arith.constant 0 : i32
    %c0_i32_2 = arith.constant 0 : i32
    return %c0_i32, %c0_i32_0, %c0_i32_1 : i32, i32, i32
  }
  func.func @transform_4(%arg0: i32) -> (i32, i32) {
    %c0_i32 = arith.constant 0 : i32
    %c0_i32_0 = arith.constant 0 : i32
    %c0_i32_1 = arith.constant 0 : i32
    return %c0_i32, %c0_i32_0 : i32, i32
  }
  func.func @transform_5(%arg0: i32) -> (i32, i32, i32) {
    %c0_i32 = arith.constant 0 : i32
    %c0_i32_0 = arith.constant 0 : i32
    %c0_i32_1 = arith.constant 0 : i32
    %c0_i32_2 = arith.constant 0 : i32
    return %c0_i32, %c0_i32_0, %c0_i32_1 : i32, i32, i32
  }
  func.func @transform_6(%arg0: i32) -> (i32, i32) {
    %c0_i32 = arith.constant 0 : i32
    %c0_i32_0 = arith.constant 0 : i32
    %c0_i32_1 = arith.constant 0 : i32
    return %c0_i32, %c0_i32_0 : i32, i32
  }
  func.func @transform_7(%arg0: i32) -> (i32, i32) {
    %c0_i32 = arith.constant 0 : i32
    %c0_i32_0 = arith.constant 0 : i32
    %c0_i32_1 = arith.constant 0 : i32
    return %c0_i32, %c0_i32_0 : i32, i32
  }
  func.func @transform_8(%arg0: i32) -> (i32, i32) {
    %c0_i32 = arith.constant 0 : i32
    %c0_i32_0 = arith.constant 0 : i32
    %c0_i32_1 = arith.constant 0 : i32
    return %c0_i32, %c0_i32_0 : i32, i32
  }
  func.func @transform_9(%arg0: i32) -> (i32, i32, i32) {
    %c0_i32 = arith.constant 0 : i32
    %c0_i32_0 = arith.constant 0 : i32
    %c0_i32_1 = arith.constant 0 : i32
    return %arg0, %c0_i32, %c0_i32_0 : i32, i32, i32
  }
}

</mosaic_0001>

<bundles_post_ra>
// kernel: tpu_custom_call.1
= control target key start
LH: loop header
LB: loop body
LE: loop exit
PB: predicated region body
PF: predicated region fallthrough
CT: control target
= control target key end

     0   :  { %vm62_vm0 = vcmask 1043456   ;;  %v2960_v2 = vmov 0.0   ;;  %vm2961_vm1 = vmmov 0   ;;  %vm46_vm2 = vcmask 31744   ;;  %s4029_s0 = inlined_call_operand.vmem [shape: f32[1,40,4], index: 0, kind: input, shape index: {}]   ;;  %s4030_s1 = inlined_call_operand.vmem [shape: f32[3,4,50], index: 1, kind: input, shape index: {}]   ;;  %s4031_s2 = inlined_call_operand.vmem [shape: f32[1,50], index: 2, kind: input, shape index: {}]   ;;  %s4032_s3 = inlined_call_operand.vmem [shape: f32[3,50,50], index: 3, kind: input, shape index: {}]   ;;  %s4033_s4 = inlined_call_operand.vmem [shape: f32[1,50], index: 4, kind: input, shape index: {}]   ;;  %s4034_s5 = inlined_call_operand.vmem [shape: f32[3,50,50], index: 5, kind: input, shape index: {}]   ;;  %s4035_s6 = inlined_call_operand.vmem [shape: f32[1,50], index: 6, kind: input, shape index: {}]   ;;  %s4036_s7 = inlined_call_operand.vmem [shape: f32[1792,4], index: 7, kind: input, shape index: {}]   ;;  %s4037_s8 = inlined_call_operand.vmem [shape: f32[1,4], index: 8, kind: input, shape index: {}]   ;;  %s4038_s9 = inlined_call_operand.hbm [shape: f32[1,2,4], index: 9, kind: output, shape index: {}]  }
   0x1   :  { %v38_v0 = vld [vmem:[%s4030_s1] sm:$0xf]  ;;  %2414 = vmatprep.subr.mxu0 %v2960_v2  ;;  %1151 = vst [vmem:[#allocation5] sm:$0xff] %v2960_v2  ;;  %1152 = vst [vmem:[#allocation5 + $0x8] sm:$0xff] %v2960_v2  ;;  %2416 = vmatprep.mubr.msk.f32.mxu0 %vm2961_vm1, %v2960_v2  ;;  %v2009_v3 = vld [vmem:[%s4030_s1 + $0x4] sm:$0xf] }
   0x2   :  { %v33_v1 = vld [vmem:[%s4029_s0] sm:$0xff]  ;;  %1153 = vst [vmem:[#allocation5 + $0x10] sm:$0xff] %v2960_v2  ;;  %1154 = vst [vmem:[#allocation5 + $0x18] sm:$0xf] %v2960_v2  ;;  %2415 = vmatpush3.msk.msra.mxu0 %vm62_vm0, %v38_v0  ;;  %v34_v4 = vld [vmem:[%s4029_s0 + $0x8] sm:$0xff] }
   0x3   :  { %2417 = vmatmul.mubr.msk.f32.vlgmr.msra.gmra.mrb[0].mxu0 %vm46_vm2, %v33_v1  ;;  %2431 = vmatprep.subr.mxu0 %v2960_v2 }
   0x4   :  { %2432 = vmatpush3.msk.msra.mxu0 %vm62_vm0, %v2009_v3  ;;  %2419 = vmatprep.mubr.msk.f32.mxu0 %vm2961_vm1, %v2960_v2 }
   0x5   :  { %2448 = vmatprep.subr.mxu0 %v2960_v2 }
   0x6   :  { %14 = vsyncpa [#allocation7], 0  ;;  %v35_v5 = vld [vmem:[%s4029_s0 + $0x10] sm:$0xff]  ;;  %v36_v6 = vld [vmem:[%s4029_s0 + $0x18] sm:$0xff]  ;;  %vm448_vm3 = vcmask 1041408   ;;  %vm411_vm5 = vcmask 408576  }
   0x7   :  { %2420 = vmatmul.mubr.msk.f32.gmra.mrb[2].mxu0 %vm46_vm2, %v34_v4  ;;  %v37_v7 = vld [vmem:[%s4029_s0 + $0x20] sm:$0xf]  ;;  %v2016_v9 = vld [vmem:[%s4030_s1 + $0x8] sm:$0xf]  ;;  %v158_v11 = vld [vmem:[%s4029_s0 + $0x12] sm:$0xff]  ;;  %vm416_vm10 = vcmask 404480  }
   0x8   :  { %2422 = vmatprep.mubr.msk.f32.mxu0 %vm2961_vm1, %v2960_v2  ;;  %v156_v8 = vld [vmem:[%s4029_s0 + $0x2] sm:$0xff]  ;;  %v157_v10 = vld [vmem:[%s4029_s0 + $0xa] sm:$0xff]  ;;  %v159_v12 = vld [vmem:[%s4029_s0 + $0x1a] sm:$0xff] }
   0x9   :  { %v160_v13 = vld [vmem:[%s4029_s0 + $0x22] sm:$0xf]  ;;  %v277_v15 = vld [vmem:[%s4029_s0 + $0xc] sm:$0xff]  ;;  %v278_v16 = vld [vmem:[%s4029_s0 + $0x14] sm:$0xff] }
   0xa   :  { %v276_v14 = vld [vmem:[%s4029_s0 + $0x4] sm:$0xff]  ;;  %v279_v17 = vld [vmem:[%s4029_s0 + $0x1c] sm:$0xff]  ;;  %v424_v22 = vld [vmem:[%s4032_s3 + $0x10] sm:$0xff] }
   0xb   :  { %2423 = vmatmul.mubr.msk.f32.gmra.mrb[4].mxu0 %vm46_vm2, %v35_v5  ;;  %v280_v18 = vld [vmem:[%s4029_s0 + $0x24] sm:$0xf]  ;;  %v423_v20 = vld [vmem:[%s4032_s3 + $0x8] sm:$0xff]  ;;  %v425_v23 = vld [vmem:[%s4032_s3 + $0x18] sm:$0xff] }
   0xc   :  { %2425 = vmatprep.mubr.msk.f32.mxu0 %vm2961_vm1, %v2960_v2  ;;  %v422_v19 = vld [vmem:[%s4032_s3] sm:$0xff]  ;;  %v2589_v24 = vpack.c.bf16 %v425_v23, %v424_v22  ;;  %v427_v26 = vld [vmem:[%s4032_s3 + $0x28] sm:$0xff]  ;;  %v428_v28 = vld [vmem:[%s4032_s3 + $0x30] sm:$0x3] }
   0xd   :  { %v2585_v21 = vpack.c.bf16 %v423_v20, %v422_v19  ;;  %v426_v25 = vld [vmem:[%s4032_s3 + $0x20] sm:$0xff]  ;;  %v2029_v29 = vld [vmem:[%s4032_s3 + $0x38] sm:$0xff]  ;;  %v2031_v52 = vld [vmem:[%s4032_s3 + $0x48] sm:$0xff] }
   0xe   :  { %v2593_v27 = vpack.c.bf16 %v427_v26, %v426_v25  ;;  %v2030_v30 = vld [vmem:[%s4032_s3 + $0x40] sm:$0xff]  ;;  %v2032_v53 = vld [vmem:[%s4032_s3 + $0x50] sm:$0xff]  ;;  %v2033_v61 = vld [vmem:[%s4032_s3 + $0x58] sm:$0xff] }
   0xf   :  { %2426 = vmatmul.mubr.msk.f32.gmra.mrb[6].mxu0 %vm46_vm2, %v36_v6  ;;  %2586 = vmatprep.subr.bf16.mxu1 %v2585_v21  ;;  %v2597_v31 = vpack.c.bf16 %v2030_v30, %v2029_v29  ;;  %v2002_v32 = vld [vmem:[%s4031_s2] ss:$0 sm:$0xff]  ;;  %v2601_v56 = vpack.c.bf16 %v2032_v53, %v2031_v52  ;;  %v2035_v3 = vld [vmem:[%s4032_s3 + $0x68] sm:$0x3]  ;;  %v2041_v5 = vld [vmem:[%s4032_s3 + $0x70] sm:$0xff] }
  0x10   :  { %2428 = vmatprep.mubr.msk.f32.mxu0 %vm2961_vm1, %v2960_v2  ;;  %2588 = vmatpush3.bf16.msra.mxu1 %v2585_v21  ;;  %v2034_v62 = vld [vmem:[%s4032_s3 + $0x60] sm:$0xff]  ;;  %v2042_v6 = vld [vmem:[%s4032_s3 + $0x78] sm:$0xff]  ;;  %v791_v26 = vld [vmem:[%s4034_s5 + $0x10] sm:$0xff] }
  0x11   :  { %2590 = vmatprep.subr.bf16.mxu1 %v2589_v24  ;;  %v2605_v0 = vpack.c.bf16 %v2034_v62, %v2033_v61  ;;  %v2047_v19 = vld [vmem:[%s4032_s3 + $0xa0] sm:$0x3]  ;;  %v794_v30 = vld [vmem:[%s4034_s5 + $0x28] sm:$0xff] }
  0x12   :  { %v789_v23 = vld [vmem:[%s4034_s5] sm:$0xff]  ;;  %v2061_v62 = vld [vmem:[%s4034_s5 + $0x48] sm:$0xff] }
  0x13   :  { %2429 = vmatmul.mubr.msk.f32.gmra.mrb[8].mxu0 %vm46_vm2, %v37_v7  ;;  %v793_v29 = vld [vmem:[%s4034_s5 + $0x20] sm:$0xff] }
  0x14   :  { %2433 = vmatprep.mubr.msk.f32.mxu0 %vm2961_vm1, %v2960_v2  ;;  %2592 = vmatpush3.bf16.msra.mxu1 %v2589_v24  ;;  %v790_v24 = vld [vmem:[%s4034_s5 + $0x8] sm:$0xff] }
  0x15   :  { %2594 = vmatprep.subr.bf16.mxu1 %v2593_v27  ;;  %v2621_v25 = vpack.c.bf16 %v790_v24, %v789_v23  ;;  %v2077_v23 = vld [vmem:[%s4034_s5 + $0xa0] sm:$0x3] }
  0x16   :  { %v1268_v24 = vld [vmem:[%s4036_s7 + $0x280] sm:$0xff] }
  0x17   :  { %2434 = vmatmul.mubr.msk.f32.vlgmr.msra.gmra.mrb[0].mxu0 %vm46_vm2, %v156_v8  ;;  %v2043_v8 = vld [vmem:[%s4032_s3 + $0x80] sm:$0xff] }
  0x18   :  { %2449 = vmatpush3.msk.msra.mxu0 %vm62_vm0, %v2016_v9  ;;  %2436 = vmatprep.mubr.msk.f32.mxu0 %vm2961_vm1, %v2960_v2  ;;  %v2044_v9 = vld [vmem:[%s4032_s3 + $0x88] sm:$0xff] }
  0x19   :  { %2596 = vmatpush3.bf16.msra.mxu1 %v2593_v27  ;;  %v792_v27 = vld [vmem:[%s4034_s5 + $0x18] sm:$0xff] }
  0x1a   :  { %2477 = vmatprep.subr.msk.mxu1 %vm448_vm3, %v428_v28 }
  0x1b   :  { %2437 = vmatmul.mubr.msk.f32.gmra.mrb[2].mxu0 %vm46_vm2, %v157_v10  ;;  %v2609_v10 = vpack.c.bf16 %v2042_v6, %v2041_v5 }
  0x1c   :  { %2439 = vmatprep.mubr.msk.f32.mxu0 %vm2961_vm1, %v2960_v2 }
  0x1d   :  { %2478 = vmatpush3.msk.msra.mxu1 %vm448_vm3, %v428_v28  ;;  %v2625_v28 = vpack.c.bf16 %v792_v27, %v791_v26  ;;  %v1252_v26 = vld [vmem:[%s4036_s7 + $0x200] sm:$0xff]  ;;  %v1253_v27 = vld [vmem:[%s4036_s7 + $0x208] sm:$0xff] }
  0x1e   :  { %2598 = vmatprep.subr.bf16.mxu1 %v2597_v31 }
  0x1f   :  { %2440 = vmatmul.mubr.msk.f32.gmra.mrb[4].mxu0 %vm46_vm2, %v158_v11  ;;  %v2613_v11 = vpack.c.bf16 %v2044_v9, %v2043_v8  ;;  %v2065_v9 = vld [vmem:[%s4034_s5 + $0x68] sm:$0x3] }
  0x20   :  { %2442 = vmatprep.mubr.msk.f32.mxu0 %vm2961_vm1, %v2960_v2 }
  0x23   :  { %2443 = vmatmul.mubr.msk.f32.gmra.mrb[6].mxu0 %vm46_vm2, %v159_v12 }
  0x24   :  { %2445 = vmatprep.mubr.msk.f32.mxu0 %vm2961_vm1, %v2960_v2 }
  0x27   :  { %2446 = vmatmul.mubr.msk.f32.gmra.mrb[8].mxu0 %vm46_vm2, %v160_v13  ;;  %v2045_v13 = vld [vmem:[%s4032_s3 + $0x90] sm:$0xff] }
  0x28   :  { %2450 = vmatprep.mubr.msk.f32.mxu0 %vm2961_vm1, %v2960_v2 }
  0x2b   :  { %2451 = vmatmul.mubr.msk.f32.vlgmr.msra.gmra.mrb[0].mxu0 %vm46_vm2, %v276_v14  ;;  %v2046_v14 = vld [vmem:[%s4032_s3 + $0x98] sm:$0xff] }
  0x2c   :  { %2453 = vmatprep.mubr.msk.f32.mxu0 %vm2961_vm1, %v2960_v2 }
  0x2f   :  { %2454 = vmatmul.mubr.msk.f32.gmra.mrb[2].mxu0 %vm46_vm2, %v277_v15 }
  0x30   :  { %2456 = vmatprep.mubr.msk.f32.mxu0 %vm2961_vm1, %v2960_v2 }
  0x33   :  { %2457 = vmatmul.mubr.msk.f32.gmra.mrb[4].mxu0 %vm46_vm2, %v278_v16  ;;  %v2617_v16 = vpack.c.bf16 %v2046_v14, %v2045_v13  ;;  %v2074_v13 = vld [vmem:[%s4034_s5 + $0x88] sm:$0xff] }
  0x34   :  { %2459 = vmatprep.mubr.msk.f32.mxu0 %vm2961_vm1, %v2960_v2 }
  0x37   :  { %2460 = vmatmul.mubr.msk.f32.gmra.mrb[6].mxu0 %vm46_vm2, %v279_v17 }
  0x38   :  { %2462 = vmatprep.mubr.msk.f32.mxu0 %vm2961_vm1, %v2960_v2 }
  0x3b   :  { %2463 = vmatmul.mubr.msk.f32.gmra.mrb[8].mxu0 %vm46_vm2, %v280_v18 }
  0xfe   :  { %v367_v33 = vpop.f32.mrb[0].mxu0 }
  0xff   :  { %v2881_v34 = vadd.f32 %v2002_v32, %v367_v33  ;;  %v2452_v35 = vpop.f32.mrb[1].mxu0  ;;  %v2059_v33 = vld [vmem:[%s4034_s5 + $0x38] sm:$0xff] }
 0x101   :  { %vm396_vm4 = vcmp.gt.f32.partialorder %v2881_v34, 0.0  ;;  %v401_v36 = vmul.f32 0.01, %v2881_v34 }
 0x102   :  { %v372_v37 = vpop.f32.mrb[2].mxu0 }
 0x103   :  { %v406_v38 = vsel %vm396_vm4, %v2881_v34, %v401_v36  ;;  %v2882_v39 = vadd.f32 %v2002_v32, %v372_v37  ;;  %v2455_v40 = vpop.f32.mrb[3].mxu0  ;;  %v2060_v34 = vld [vmem:[%s4034_s5 + $0x40] sm:$0xff]  ;;  %v1205_v37 = vld [vmem:[%s4036_s7 + $0x88] sm:$0xff]  ;;  %vm1986_vm4 = vcmask 25600  }
 0x104   :  { %412 = vst.msk [vmem:[#allocation2] sm:$0xff] %vm411_vm5, %v406_v38  ;;  %v2633_v35 = vpack.c.bf16 %v2060_v34, %v2059_v33  ;;  %v1204_v36 = vld [vmem:[%s4036_s7 + $0x80] sm:$0xff]  ;;  %v1189_v40 = vld [vmem:[%s4036_s7 + $0x8] sm:$0xff]  ;;  %v1254_v33 = vld [vmem:[%s4036_s7 + $0x210] sm:$0xff] }
 0x105   :  { %vm397_vm6 = vcmp.gt.f32.partialorder %v2882_v39, 0.0  ;;  %v402_v41 = vmul.f32 0.01, %v2882_v39  ;;  %v2657_v38 = vpack.c.bf16 %v1205_v37, %v1204_v36  ;;  %v1255_v34 = vld [vmem:[%s4036_s7 + $0x218] sm:$0xff] }
 0x106   :  { %v377_v42 = vpop.f32.mrb[4].mxu0  ;;  %v2727_v37 = vpack.c.bf16 %v1255_v34, %v1254_v33  ;;  %v1265_v33 = vld [vmem:[%s4036_s7 + $0x268] sm:$0xff]  ;;  %v1200_v34 = vld [vmem:[%s4036_s7 + $0x60] sm:$0xff] }
 0x107   :  { %v407_v43 = vsel %vm397_vm6, %v2882_v39, %v402_v41  ;;  %v2883_v44 = vadd.f32 %v2002_v32, %v377_v42  ;;  %v2458_v45 = vpop.f32.mrb[5].mxu0  ;;  %v1188_v39 = vld [vmem:[%s4036_s7] sm:$0xff]  ;;  %v1206_v42 = vld [vmem:[%s4036_s7 + $0x90] sm:$0xff]  ;;  %2658 = vmatprep.subr.bf16.mxu0 %v2657_v38 }
 0x108   :  { %413 = vst.msk [vmem:[#allocation2 + $0x8] sm:$0xff] %vm411_vm5, %v407_v43  ;;  %v2659_v41 = vpack.c.bf16 %v1189_v40, %v1188_v39  ;;  %v1207_v43 = vld [vmem:[%s4036_s7 + $0x98] sm:$0xff]  ;;  %v2023_v45 = vld [vmem:[%s4033_s4] ss:$0 sm:$0xff]  ;;  %v1190_v39 = vld [vmem:[%s4036_s7 + $0x10] sm:$0xff] }
 0x109   :  { %vm398_vm7 = vcmp.gt.f32.partialorder %v2883_v44, 0.0  ;;  %v403_v46 = vmul.f32 0.01, %v2883_v44  ;;  %v1191_v40 = vld [vmem:[%s4036_s7 + $0x18] sm:$0xff] }
 0x10a   :  { %v382_v47 = vpop.f32.mrb[6].mxu0  ;;  %2660 = vmatpush3.bf16.msra.mxu0 %v2659_v41  ;;  %v2663_v41 = vpack.c.bf16 %v1191_v40, %v1190_v39  ;;  %v1283_v39 = vld [vmem:[%s4036_s7 + $0x2f8] sm:$0xff]  ;;  %v1218_v40 = vld [vmem:[%s4036_s7 + $0xf0] sm:$0xff] }
 0x10b   :  { %v408_v48 = vsel %vm398_vm7, %v2883_v44, %v403_v46  ;;  %v2884_v49 = vadd.f32 %v2002_v32, %v382_v47  ;;  %v2461_v50 = vpop.f32.mrb[7].mxu0  ;;  %v418_v51 = vld [vmem:[#allocation2] sm:$0xff]  ;;  %v2661_v44 = vpack.c.bf16 %v1207_v43, %v1206_v42  ;;  %v1272_v42 = vld [vmem:[%s4036_s7 + $0x2a0] sm:$0xff]  ;;  %v1273_v43 = vld [vmem:[%s4036_s7 + $0x2a8] sm:$0xff] }
 0x10c   :  { %414 = vst.msk [vmem:[#allocation2 + $0x10] sm:$0xff] %vm411_vm5, %v408_v48  ;;  %2479 = vmatprep.mubr.msk.f32.mxu1 %vm411_vm5, %v418_v51 }
 0x10d   :  { %vm399_vm8 = vcmp.gt.f32.partialorder %v2884_v49, 0.0  ;;  %v404_v54 = vmul.f32 0.01, %v2884_v49  ;;  %2662 = vmatprep.subr.bf16.mxu0 %v2661_v44  ;;  %v2729_v44 = vpack.c.bf16 %v1273_v43, %v1272_v42  ;;  %v1219_v42 = vld [vmem:[%s4036_s7 + $0xf8] sm:$0xff]  ;;  %v1266_v43 = vld [vmem:[%s4036_s7 + $0x270] sm:$0xff] }
 0x10e   :  { %v387_v55 = vpop.f32.mrb[8].mxu0  ;;  %2664 = vmatpush3.bf16.msra.mxu0 %v2663_v41 }
 0x10f   :  { %v409_v57 = vsel %vm399_vm8, %v2884_v49, %v404_v54  ;;  %v2885_v58 = vadd.f32 %v2002_v32, %v387_v55  ;;  %v2464_v59 = vpop.f32.mrb[9].mxu0  ;;  %v419_v60 = vld [vmem:[#allocation2 + $0x8] sm:$0xff]  ;;  %v795_v32 = vld [vmem:[%s4034_s5 + $0x30] sm:$0x3] }
 0x110   :  { %415 = vst.msk [vmem:[#allocation2 + $0x18] sm:$0xff] %vm411_vm5, %v409_v57  ;;  %2480 = vmatmul.mubr.msk.f32.vlgmr.msra.gmra.mrb[0].mxu1 %vm411_vm5, %v419_v60  ;;  %v537_v7 = vld [vmem:[#allocation2 + $0x2] sm:$0xff] }
 0x111   :  { %vm400_vm9 = vcmp.gt.f32.partialorder %v2885_v58, 0.0  ;;  %v405_v63 = vmul.f32 0.01, %v2885_v58  ;;  %2600 = vmatpush3.bf16.msra.mxu1 %v2597_v31  ;;  %v653_v18 = vld [vmem:[#allocation2 + $0x4] sm:$0xff]  ;;  %v2629_v31 = vpack.c.bf16 %v794_v30, %v793_v29 }
 0x112   :  { %2602 = vmatprep.subr.bf16.mxu1 %v2601_v56  ;;  %v1271_v29 = vld [vmem:[%s4036_s7 + $0x298] sm:$0xff] }
 0x113   :  { %v410_v1 = vsel %vm400_vm9, %v2885_v58, %v405_v63  ;;  %v420_v2 = vld [vmem:[#allocation2 + $0x10] sm:$0xff]  ;;  %v2062_v63 = vld [vmem:[%s4034_s5 + $0x50] sm:$0xff] }
 0x114   :  { %417 = vst.msk [vmem:[#allocation2 + $0x20] sm:$0xf] %vm416_vm10, %v410_v1  ;;  %2482 = vmatprep.mubr.msk.f32.mxu1 %vm411_vm5, %v420_v2  ;;  %v538_v12 = vld [vmem:[#allocation2 + $0xa] sm:$0xff]  ;;  %v2637_v1 = vpack.c.bf16 %v2062_v63, %v2061_v62  ;;  %v1194_v62 = vld [vmem:[%s4036_s7 + $0x30] sm:$0xff]  ;;  %v1195_v63 = vld [vmem:[%s4036_s7 + $0x38] sm:$0xff] }
 0x115   :  { %2604 = vmatpush3.bf16.msra.mxu1 %v2601_v56  ;;  %v654_v20 = vld [vmem:[#allocation2 + $0xc] sm:$0xff] }
 0x116   :  { %2606 = vmatprep.subr.bf16.mxu1 %v2605_v0 }
 0x117   :  { %v421_v4 = vld [vmem:[#allocation2 + $0x18] sm:$0xff] }
 0x118   :  { %2483 = vmatmul.mubr.msk.f32.gmra.mrb[2].mxu1 %vm411_vm5, %v421_v4  ;;  %v539_v15 = vld [vmem:[#allocation2 + $0x12] sm:$0xff]  ;;  %v2064_v4 = vld [vmem:[%s4034_s5 + $0x60] sm:$0xff] }
 0x119   :  { %2608 = vmatpush3.bf16.msra.mxu1 %v2605_v0  ;;  %2499 = vmatprep.mubr.msk.f32.mxu1 %vm411_vm5, %v537_v7  ;;  %v655_v21 = vld [vmem:[#allocation2 + $0x14] sm:$0xff] }
 0x11a   :  { %2497 = vmatprep.subr.msk.mxu1 %vm448_vm3, %v2035_v3 }
 0x11b   :  { %v540_v17 = vld [vmem:[#allocation2 + $0x1a] sm:$0xff] }
 0x11c   :  { %v656_v22 = vld [vmem:[#allocation2 + $0x1c] sm:$0xff] }
 0x11d   :  { %2498 = vmatpush3.msk.msra.mxu1 %vm448_vm3, %v2035_v3  ;;  %v2063_v3 = vld [vmem:[%s4034_s5 + $0x58] sm:$0xff] }
 0x11e   :  { %2500 = vmatmul.mubr.msk.f32.vlgmr.msra.gmra.mrb[0].mxu1 %vm411_vm5, %v538_v12  ;;  %2610 = vmatprep.subr.bf16.mxu1 %v2609_v10  ;;  %v2641_v6 = vpack.c.bf16 %v2064_v4, %v2063_v3  ;;  %v2073_v12 = vld [vmem:[%s4034_s5 + $0x80] sm:$0xff]  ;;  %v1277_v3 = vld [vmem:[%s4036_s7 + $0x2c8] sm:$0xff] }
 0x11f   :  { %2502 = vmatprep.mubr.msk.f32.mxu1 %vm411_vm5, %v539_v15  ;;  %2612 = vmatpush3.bf16.msra.mxu1 %v2609_v10  ;;  %v2071_v10 = vld [vmem:[%s4034_s5 + $0x70] sm:$0xff]  ;;  %v2649_v15 = vpack.c.bf16 %v2074_v13, %v2073_v12 }
 0x120   :  { %2614 = vmatprep.subr.bf16.mxu1 %v2613_v11 }
 0x122   :  { %2503 = vmatmul.mubr.msk.f32.gmra.mrb[2].mxu1 %vm411_vm5, %v540_v17  ;;  %v2075_v17 = vld [vmem:[%s4034_s5 + $0x90] sm:$0xff] }
 0x123   :  { %2616 = vmatpush3.bf16.msra.mxu1 %v2613_v11  ;;  %2519 = vmatprep.mubr.msk.f32.mxu1 %vm411_vm5, %v653_v18  ;;  %v2072_v11 = vld [vmem:[%s4034_s5 + $0x78] sm:$0xff] }
 0x124   :  { %2618 = vmatprep.subr.bf16.mxu1 %v2617_v16  ;;  %v2645_v14 = vpack.c.bf16 %v2072_v11, %v2071_v10  ;;  %v2076_v18 = vld [vmem:[%s4034_s5 + $0x98] sm:$0xff]  ;;  %v1196_v10 = vld [vmem:[%s4036_s7 + $0x40] sm:$0xff]  ;;  %v1197_v11 = vld [vmem:[%s4036_s7 + $0x48] sm:$0xff] }
 0x125   :  { %v2675_v13 = vpack.c.bf16 %v1197_v11, %v1196_v10  ;;  %v1427_v11 = vlaneseq }
 0x127   :  { %2620 = vmatpush3.bf16.msra.mxu1 %v2617_v16 }
 0x128   :  { %2517 = vmatprep.subr.msk.mxu1 %vm448_vm3, %v2047_v19 }
 0x12b   :  { %2518 = vmatpush3.msk.msra.mxu1 %vm448_vm3, %v2047_v19 }
 0x12c   :  { %2520 = vmatmul.mubr.msk.f32.vlgmr.msra.gmra.mrb[0].mxu1 %vm411_vm5, %v654_v20  ;;  %2622 = vmatprep.subr.bf16.mxu1 %v2621_v25  ;;  %v2653_v20 = vpack.c.bf16 %v2076_v18, %v2075_v17  ;;  %v1214_v17 = vld [vmem:[%s4036_s7 + $0xd0] sm:$0xff]  ;;  %v1215_v18 = vld [vmem:[%s4036_s7 + $0xd8] sm:$0xff] }
 0x12d   :  { %2522 = vmatprep.mubr.msk.f32.mxu1 %vm411_vm5, %v655_v21  ;;  %2624 = vmatpush3.bf16.msra.mxu1 %v2621_v25  ;;  %v1269_v25 = vld [vmem:[%s4036_s7 + $0x288] sm:$0xff] }
 0x12e   :  { %2626 = vmatprep.subr.bf16.mxu1 %v2625_v28  ;;  %v2721_v30 = vpack.c.bf16 %v1269_v25, %v1268_v24 }
 0x130   :  { %2523 = vmatmul.mubr.msk.f32.gmra.mrb[2].mxu1 %vm411_vm5, %v656_v22 }
 0x131   :  { %2628 = vmatpush3.bf16.msra.mxu1 %v2625_v28  ;;  %v1270_v28 = vld [vmem:[%s4036_s7 + $0x290] sm:$0xff] }
 0x132   :  { %2630 = vmatprep.subr.bf16.mxu1 %v2629_v31 }
 0x135   :  { %2632 = vmatpush3.bf16.msra.mxu1 %v2629_v31  ;;  %v2723_v31 = vpack.c.bf16 %v1253_v27, %v1252_v26  ;;  %v1280_v26 = vld [vmem:[%s4036_s7 + $0x2e0] sm:$0xff]  ;;  %v1281_v27 = vld [vmem:[%s4036_s7 + $0x2e8] sm:$0xff] }
 0x136   :  { %2537 = vmatprep.subr.msk.mxu1 %vm448_vm3, %v795_v32 }
 0x139   :  { %2538 = vmatpush3.msk.msra.mxu1 %vm448_vm3, %v795_v32  ;;  %v2725_v32 = vpack.c.bf16 %v1271_v29, %v1270_v28  ;;  %v2745_v28 = vpack.c.bf16 %v1281_v27, %v1280_v26  ;;  %v1216_v29 = vld [vmem:[%s4036_s7 + $0xe0] sm:$0xff] }
 0x13a   :  { %2634 = vmatprep.subr.bf16.mxu1 %v2633_v35 }
 0x1ff   :  { %v2521_v46 = vpop.f32.mrb[0].mxu1 }
 0x200   :  { %v2886_v47 = vadd.f32 %v2521_v46, %v2023_v45  ;;  %v746_v48 = vpop.f32.mrb[1].mxu1  ;;  %v1209_v46 = vld [vmem:[%s4036_s7 + $0xa8] sm:$0xff] }
 0x201   :  { %v2887_v49 = vadd.f32 %v2023_v45, %v746_v48 }
 0x202   :  { %vm770_vm11 = vcmp.gt.f32.partialorder %v2886_v47, 0.0  ;;  %v774_v50 = vmul.f32 0.01, %v2886_v47 }
 0x203   :  { %vm769_vm12 = vcmp.gt.f32.partialorder %v2887_v49, 0.0  ;;  %v773_v51 = vmul.f32 0.01, %v2887_v49  ;;  %v2524_v52 = vpop.f32.mrb[2].mxu1 }
 0x204   :  { %v778_v53 = vsel %vm770_vm11, %v2886_v47, %v774_v50  ;;  %v2888_v54 = vadd.f32 %v2524_v52, %v2023_v45  ;;  %v756_v55 = vpop.f32.mrb[3].mxu1  ;;  %v1256_v47 = vld [vmem:[%s4036_s7 + $0x220] sm:$0xff] }
 0x205   :  { %782 = vst.msk [vmem:[#allocation3 + $0x8] sm:$0xff] %vm411_vm5, %v778_v53  ;;  %v777_v56 = vsel %vm769_vm12, %v2887_v49, %v773_v51  ;;  %v2889_v57 = vadd.f32 %v2023_v45, %v756_v55  ;;  %v1208_v45 = vld [vmem:[%s4036_s7 + $0xa0] sm:$0xff]  ;;  %v1257_v49 = vld [vmem:[%s4036_s7 + $0x228] sm:$0xff]  ;;  %v1275_v55 = vld [vmem:[%s4036_s7 + $0x2b8] sm:$0xff] }
 0x206   :  { %781 = vst.msk [vmem:[#allocation3] sm:$0xff] %vm411_vm5, %v777_v56  ;;  %vm772_vm13 = vcmp.gt.f32.partialorder %v2888_v54, 0.0  ;;  %v776_v58 = vmul.f32 0.01, %v2888_v54  ;;  %v2665_v48 = vpack.c.bf16 %v1209_v46, %v1208_v45  ;;  %v1192_v50 = vld [vmem:[%s4036_s7 + $0x20] sm:$0xff]  ;;  %v1193_v51 = vld [vmem:[%s4036_s7 + $0x28] sm:$0xff]  ;;  %v2731_v52 = vpack.c.bf16 %v1257_v49, %v1256_v47 }
 0x207   :  { %vm771_vm14 = vcmp.gt.f32.partialorder %v2889_v57, 0.0  ;;  %v775_v59 = vmul.f32 0.01, %v2889_v57  ;;  %v2667_v53 = vpack.c.bf16 %v1193_v51, %v1192_v50  ;;  %v2685_v45 = vpack.c.bf16 %v1219_v42, %v1218_v40  ;;  %v1202_v47 = vld [vmem:[%s4036_s7 + $0x70] sm:$0xff]  ;;  %v1332_v50 = vld [vmem:[%s4036_s7 + $0x480] sm:$0xff]  ;;  %v1333_v51 = vld [vmem:[%s4036_s7 + $0x488] sm:$0xff] }
 0x208   :  { %v780_v60 = vsel %vm772_vm13, %v2888_v54, %v776_v58  ;;  %2666 = vmatprep.subr.bf16.mxu0 %v2665_v48  ;;  %v1274_v54 = vld [vmem:[%s4036_s7 + $0x2b0] sm:$0xff]  ;;  %v1211_v58 = vld [vmem:[%s4036_s7 + $0xb8] sm:$0xff] }
 0x209   :  { %784 = vst.msk [vmem:[#allocation3 + $0x18] sm:$0xff] %vm411_vm5, %v780_v60  ;;  %v779_v61 = vsel %vm771_vm14, %v2889_v57, %v775_v59  ;;  %2668 = vmatpush3.bf16.msra.mxu0 %v2667_v53  ;;  %v2733_v56 = vpack.c.bf16 %v1275_v55, %v1274_v54  ;;  %v1210_v57 = vld [vmem:[%s4036_s7 + $0xb0] sm:$0xff]  ;;  %v1203_v48 = vld [vmem:[%s4036_s7 + $0x78] sm:$0xff]  ;;  %v1236_v53 = vld [vmem:[%s4036_s7 + $0x180] sm:$0xff] }
 0x20a   :  { %783 = vst.msk [vmem:[#allocation3 + $0x10] sm:$0xff] %vm411_vm5, %v779_v61  ;;  %v1258_v59 = vld [vmem:[%s4036_s7 + $0x230] sm:$0xff]  ;;  %v2669_v60 = vpack.c.bf16 %v1211_v58, %v1210_v57  ;;  %v1259_v61 = vld [vmem:[%s4036_s7 + $0x238] sm:$0xff]  ;;  %v2687_v49 = vpack.c.bf16 %v1203_v48, %v1202_v47  ;;  %v1237_v54 = vld [vmem:[%s4036_s7 + $0x188] sm:$0xff] }
 0x20b   :  { %v2689_v55 = vpack.c.bf16 %v1237_v54, %v1236_v53  ;;  %v1238_v40 = vld [vmem:[%s4036_s7 + $0x190] sm:$0xff]  ;;  %v1319_v48 = vld [vmem:[%s4036_s7 + $0x418] sm:$0xff]  ;;  %v1336_v54 = vld [vmem:[%s4036_s7 + $0x4a0] sm:$0xff] }
 0x20c   :  { %v786_v2 = vld [vmem:[#allocation3 + $0x8] sm:$0xff]  ;;  %2670 = vmatprep.subr.bf16.mxu0 %v2669_v60 }
 0x20d   :  { %v785_v0 = vld [vmem:[#allocation3] sm:$0xff] }
 0x20e   :  { %2539 = vmatprep.mubr.msk.f32.mxu1 %vm411_vm5, %v785_v0  ;;  %v903_v8 = vld [vmem:[#allocation3 + $0x2] sm:$0xff]  ;;  %v2735_v0 = vpack.c.bf16 %v1259_v61, %v1258_v59 }
 0x20f   :  { %2540 = vmatmul.mubr.msk.f32.vlgmr.msra.gmra.mrb[4].mxu1 %vm411_vm5, %v786_v2  ;;  %v1019_v22 = vld [vmem:[#allocation3 + $0x4] sm:$0xff] }
 0x210   :  { %2636 = vmatpush3.bf16.msra.mxu1 %v2633_v35  ;;  %v788_v7 = vld [vmem:[#allocation3 + $0x18] sm:$0xf]  ;;  %v1022_v38 = vld [vmem:[#allocation3 + $0x1c] sm:$0xf]  ;;  %v1276_v2 = vld [vmem:[%s4036_s7 + $0x2c0] sm:$0xff] }
 0x211   :  { %v787_v5 = vld [vmem:[#allocation3 + $0x10] sm:$0xff]  ;;  %2638 = vmatprep.subr.bf16.mxu1 %v2637_v1  ;;  %v906_v21 = vld [vmem:[#allocation3 + $0x1a] sm:$0xf]  ;;  %v2737_v4 = vpack.c.bf16 %v1277_v3, %v1276_v2 }
 0x212   :  { %2542 = vmatprep.mubr.msk.f32.mxu1 %vm411_vm5, %v787_v5  ;;  %v904_v16 = vld [vmem:[#allocation3 + $0xa] sm:$0xff]  ;;  %v905_v19 = vld [vmem:[#allocation3 + $0x12] sm:$0xff]  ;;  %v1212_v5 = vld [vmem:[%s4036_s7 + $0xc0] sm:$0xff] }
 0x213   :  { %2543 = vmatmul.mubr.msk.f32.gmra.mrb[6].mxu1 %vm411_vm5, %v788_v7  ;;  %v1020_v35 = vld [vmem:[#allocation3 + $0xc] sm:$0xff]  ;;  %v1021_v36 = vld [vmem:[#allocation3 + $0x14] sm:$0xff]  ;;  %v1260_v7 = vld [vmem:[%s4036_s7 + $0x240] sm:$0xff] }
 0x214   :  { %2640 = vmatpush3.bf16.msra.mxu1 %v2637_v1  ;;  %2559 = vmatprep.mubr.msk.f32.mxu1 %vm411_vm5, %v903_v8  ;;  %v2671_v1 = vpack.c.bf16 %v1195_v63, %v1194_v62 }
 0x215   :  { %2642 = vmatprep.subr.bf16.mxu1 %v2641_v6 }
 0x216   :  { %2672 = vmatpush3.bf16.msra.mxu0 %v2671_v1 }
 0x218   :  { %2644 = vmatpush3.bf16.msra.mxu1 %v2641_v6  ;;  %v1213_v6 = vld [vmem:[%s4036_s7 + $0xc8] sm:$0xff] }
 0x219   :  { %2557 = vmatprep.subr.msk.mxu1 %vm448_vm3, %v2065_v9  ;;  %v2673_v8 = vpack.c.bf16 %v1213_v6, %v1212_v5 }
 0x21b   :  { %2674 = vmatprep.subr.bf16.mxu0 %v2673_v8 }
 0x21c   :  { %2558 = vmatpush3.msk.msra.mxu1 %vm448_vm3, %v2065_v9  ;;  %v1261_v9 = vld [vmem:[%s4036_s7 + $0x248] sm:$0xff]  ;;  %2676 = vmatpush3.bf16.msra.mxu0 %v2675_v13 }
 0x21d   :  { %2560 = vmatmul.mubr.msk.f32.vlgmr.msra.gmra.mrb[4].mxu1 %vm411_vm5, %v904_v16  ;;  %2646 = vmatprep.subr.bf16.mxu1 %v2645_v14  ;;  %v2739_v12 = vpack.c.bf16 %v1261_v9, %v1260_v7  ;;  %v2962_v9 = vmov 1983009808  }
 0x21e   :  { %2562 = vmatprep.mubr.msk.f32.mxu1 %vm411_vm5, %v905_v19  ;;  %2648 = vmatpush3.bf16.msra.mxu1 %v2645_v14  ;;  %v1278_v14 = vld [vmem:[%s4036_s7 + $0x2d0] sm:$0xff]  ;;  %v1425_v10 = vunpack.c.l.s4 %v2962_v9 }
 0x21f   :  { %2650 = vmatprep.subr.bf16.mxu1 %v2649_v15  ;;  %v1262_v19 = vld [vmem:[%s4036_s7 + $0x250] sm:$0xff] }
 0x221   :  { %2563 = vmatmul.mubr.msk.f32.gmra.mrb[6].mxu1 %vm411_vm5, %v906_v21  ;;  %v1263_v21 = vld [vmem:[%s4036_s7 + $0x258] sm:$0xff] }
 0x222   :  { %2652 = vmatpush3.bf16.msra.mxu1 %v2649_v15  ;;  %2579 = vmatprep.mubr.msk.f32.mxu1 %vm411_vm5, %v1019_v22  ;;  %v1279_v15 = vld [vmem:[%s4036_s7 + $0x2d8] sm:$0xff]  ;;  %v1198_v22 = vld [vmem:[%s4036_s7 + $0x50] sm:$0xff]  ;;  %v2743_v24 = vpack.c.bf16 %v1263_v21, %v1262_v19  ;;  %v1428_v21 = vshrl.u32 %v1427_v11, 7 }
 0x223   :  { %2654 = vmatprep.subr.bf16.mxu1 %v2653_v20  ;;  %v2741_v16 = vpack.c.bf16 %v1279_v15, %v1278_v14 }
 0x226   :  { %2656 = vmatpush3.bf16.msra.mxu1 %v2653_v20  ;;  %v2677_v20 = vpack.c.bf16 %v1215_v18, %v1214_v17 }
 0x227   :  { %2577 = vmatprep.subr.msk.mxu1 %vm448_vm3, %v2077_v23 }
 0x228   :  { %2678 = vmatprep.subr.bf16.mxu0 %v2677_v20  ;;  %v1426_v20 = vunpack.c.0.s8 %v1425_v10 }
 0x22a   :  { %2578 = vmatpush3.msk.msra.mxu1 %vm448_vm3, %v2077_v23  ;;  %v1199_v23 = vld [vmem:[%s4036_s7 + $0x58] sm:$0xff]  ;;  %vm1156_vm3 = vcmask 402432  }
 0x22b   :  { %2580 = vmatmul.mubr.msk.f32.vlgmr.msra.gmra.mrb[4].mxu1 %vm411_vm5, %v1020_v35  ;;  %2722 = vmatprep.subr.bf16.mxu1 %v2721_v30  ;;  %v2679_v25 = vpack.c.bf16 %v1199_v23, %v1198_v22  ;;  %v1217_v30 = vld [vmem:[%s4036_s7 + $0xe8] sm:$0xff] }
 0x22c   :  { %2582 = vmatprep.mubr.msk.f32.mxu1 %vm411_vm5, %v1021_v36  ;;  %2724 = vmatpush3.bf16.msra.mxu1 %v2723_v31  ;;  %v1264_v31 = vld [vmem:[%s4036_s7 + $0x260] sm:$0xff]  ;;  %v1201_v35 = vld [vmem:[%s4036_s7 + $0x68] sm:$0xff] }
 0x22d   :  { %2726 = vmatprep.subr.bf16.mxu1 %v2725_v32  ;;  %2680 = vmatpush3.bf16.msra.mxu0 %v2679_v25  ;;  %v2681_v32 = vpack.c.bf16 %v1217_v30, %v1216_v29  ;;  %v2747_v36 = vpack.c.bf16 %v1265_v33, %v1264_v31  ;;  %v1316_v29 = vld [vmem:[%s4036_s7 + $0x400] sm:$0xff]  ;;  %v1317_v31 = vld [vmem:[%s4036_s7 + $0x408] sm:$0xff] }
 0x22f   :  { %2583 = vmatmul.mubr.msk.f32.gmra.mrb[6].mxu1 %vm411_vm5, %v1022_v38  ;;  %v1282_v38 = vld [vmem:[%s4036_s7 + $0x2f0] sm:$0xff]  ;;  %2682 = vmatprep.subr.bf16.mxu0 %v2681_v32  ;;  %v1220_v32 = vld [vmem:[%s4036_s7 + $0x100] sm:$0xff] }
 0x230   :  { %2728 = vmatpush3.bf16.msra.mxu1 %v2727_v37  ;;  %v2683_v37 = vpack.c.bf16 %v1201_v35, %v1200_v34  ;;  %v2749_v41 = vpack.c.bf16 %v1283_v39, %v1282_v38  ;;  %v1221_v35 = vld [vmem:[%s4036_s7 + $0x108] sm:$0xff]  ;;  %v1335_v39 = vld [vmem:[%s4036_s7 + $0x498] sm:$0xff] }
 0x231   :  { %2730 = vmatprep.subr.bf16.mxu1 %v2729_v44  ;;  %v1267_v44 = vld [vmem:[%s4036_s7 + $0x278] sm:$0xff] }
 0x232   :  { %2684 = vmatpush3.bf16.msra.mxu0 %v2683_v37  ;;  %v2751_v46 = vpack.c.bf16 %v1267_v44, %v1266_v43  ;;  %v2787_v43 = vpack.c.bf16 %v1317_v31, %v1316_v29  ;;  %v1318_v44 = vld [vmem:[%s4036_s7 + $0x410] sm:$0xff]  ;;  %v1229_v29 = vld [vmem:[%s4036_s7 + $0x148] sm:$0xff] }
 0x233   :  { %2686 = vmatprep.subr.bf16.mxu0 %v2685_v45  ;;  %v1342_v31 = vld [vmem:[%s4036_s7 + $0x4d0] sm:$0xff] }
 0x234   :  { %2732 = vmatpush3.bf16.msra.mxu1 %v2731_v52  ;;  %v2785_v52 = vpack.c.bf16 %v1333_v51, %v1332_v50  ;;  %v1223_v50 = vld [vmem:[%s4036_s7 + $0x118] sm:$0xff] }
 0x235   :  { %2734 = vmatprep.subr.bf16.mxu1 %v2733_v56  ;;  %v2053_v56 = vld [vmem:[%s4035_s6] ss:$0 sm:$0xff] }
 0x236   :  { %2688 = vmatpush3.bf16.msra.mxu0 %v2687_v49  ;;  %v1222_v49 = vld [vmem:[%s4036_s7 + $0x110] sm:$0xff] }
 0x237   :  { %2690 = vmatprep.subr.bf16.mxu0 %v2689_v55  ;;  %v1337_v55 = vld [vmem:[%s4036_s7 + $0x4a8] sm:$0xff] }
 0x238   :  { %2736 = vmatpush3.bf16.msra.mxu1 %v2735_v0 }
 0x239   :  { %2738 = vmatprep.subr.bf16.mxu1 %v2737_v4 }
 0x23c   :  { %2740 = vmatpush3.bf16.msra.mxu1 %v2739_v12 }
 0x23d   :  { %2742 = vmatprep.subr.bf16.mxu1 %v2741_v16 }
 0x240   :  { %2744 = vmatpush3.bf16.msra.mxu1 %v2743_v24 }
 0x241   :  { %2746 = vmatprep.subr.bf16.mxu1 %v2745_v28  ;;  %v3499_v28 = vsub.s32 %v1426_v20, %v1428_v21  ;;  %v1245_v20 = vld [vmem:[%s4036_s7 + $0x1c8] sm:$0xff] }
 0x244   :  { %2748 = vmatpush3.bf16.msra.mxu1 %v2747_v36  ;;  %v1334_v36 = vld [vmem:[%s4036_s7 + $0x490] sm:$0xff] }
 0x245   :  { %2750 = vmatprep.subr.bf16.mxu1 %v2749_v41  ;;  %v1239_v41 = vld [vmem:[%s4036_s7 + $0x198] sm:$0xff]  ;;  %v2789_v51 = vpack.c.bf16 %v1335_v39, %v1334_v36 }
 0x246   :  { %v1327_v39 = vld [vmem:[%s4036_s7 + $0x458] sm:$0xff] }
 0x248   :  { %2752 = vmatpush3.bf16.msra.mxu1 %v2751_v46  ;;  %v2691_v46 = vpack.c.bf16 %v1221_v35, %v1220_v32  ;;  %v1343_v32 = vld [vmem:[%s4036_s7 + $0x4d8] sm:$0xff] }
 0x249   :  { %2786 = vmatprep.subr.bf16.mxu1 %v2785_v52  ;;  %v2693_v52 = vpack.c.bf16 %v1239_v41, %v1238_v40  ;;  %v1230_v40 = vld [vmem:[%s4036_s7 + $0x150] sm:$0xff] }
 0x2fe   :  { %v2581_v57 = vpop.f32.mrb[4].mxu1 }
 0x2ff   :  { %v2890_v58 = vadd.f32 %v2581_v57, %v2053_v56  ;;  %v1112_v59 = vpop.f32.mrb[5].mxu1 }
 0x300   :  { %v2891_v60 = vadd.f32 %v2053_v56, %v1112_v59  ;;  %v1241_v59 = vld [vmem:[%s4036_s7 + $0x1a8] sm:$0xff] }
 0x301   :  { %vm1136_vm15 = vcmp.gt.f32.partialorder %v2890_v58, 0.0  ;;  %v1140_v61 = vmul.f32 0.01, %v2890_v58 }
 0x302   :  { %vm1135_vm0 = vcmp.gt.f32.partialorder %v2891_v60, 0.0  ;;  %v1139_v62 = vmul.f32 0.01, %v2891_v60  ;;  %v2584_v63 = vpop.f32.mrb[6].mxu1 }
 0x303   :  { %v1144_v0 = vsel %vm1136_vm15, %v2890_v58, %v1140_v61  ;;  %v2892_v1 = vadd.f32 %v2584_v63, %v2053_v56  ;;  %v1122_v2 = vpop.f32.mrb[7].mxu1  ;;  %v1240_v58 = vld [vmem:[%s4036_s7 + $0x1a0] sm:$0xff]  ;;  %v2793_v63 = vpack.c.bf16 %v1337_v55, %v1336_v54 }
 0x304   :  { %1148 = vst.msk [vmem:[#allocation4 + $0x8] sm:$0xff] %vm411_vm5, %v1144_v0  ;;  %v1143_v3 = vsel %vm1135_vm0, %v2891_v60, %v1139_v62  ;;  %v2893_v4 = vadd.f32 %v2053_v56, %v1122_v2  ;;  %v2791_v60 = vpack.c.bf16 %v1319_v48, %v1318_v44  ;;  %v2695_v62 = vpack.c.bf16 %v1223_v50, %v1222_v49  ;;  %v1320_v0 = vld [vmem:[%s4036_s7 + $0x420] sm:$0xff]  ;;  %v1345_v44 = vld [vmem:[%s4036_s7 + $0x4e8] sm:$0xff] }
 0x305   :  { %1147 = vst.msk [vmem:[#allocation4] sm:$0xff] %vm411_vm5, %v1143_v3  ;;  %vm1138_vm1 = vcmp.gt.f32.partialorder %v2892_v1, 0.0  ;;  %v1142_v5 = vmul.f32 0.01, %v2892_v1  ;;  %v1224_v2 = vld [vmem:[%s4036_s7 + $0x120] sm:$0xff]  ;;  %v2697_v3 = vpack.c.bf16 %v1241_v59, %v1240_v58  ;;  %v1346_v58 = vld [vmem:[%s4036_s7 + $0x4f0] sm:$0xff] }
 0x306   :  { %vm1137_vm2 = vcmp.gt.f32.partialorder %v2893_v4, 0.0  ;;  %v1141_v6 = vmul.f32 0.01, %v2893_v4  ;;  %v1232_v54 = vld [vmem:[%s4036_s7 + $0x160] sm:$0xff]  ;;  %v1347_v59 = vld [vmem:[%s4036_s7 + $0x4f8] sm:$0xff] }
 0x307   :  { %v1146_v7 = vsel %vm1138_vm1, %v2892_v1, %v1142_v5  ;;  %v1321_v1 = vld [vmem:[%s4036_s7 + $0x428] sm:$0xff]  ;;  %v1338_v5 = vld [vmem:[%s4036_s7 + $0x4b0] sm:$0xff] }
 0x308   :  { %1150 = vst.msk [vmem:[#allocation4 + $0x18] sm:$0xf] %vm416_vm10, %v1146_v7  ;;  %v1145_v8 = vsel %vm1137_vm2, %v2893_v4, %v1141_v6  ;;  %v1225_v4 = vld [vmem:[%s4036_s7 + $0x128] sm:$0xff]  ;;  %v1339_v6 = vld [vmem:[%s4036_s7 + $0x4b8] sm:$0xff]  ;;  %v1242_v7 = vld [vmem:[%s4036_s7 + $0x1b0] sm:$0xff]  ;;  %v2795_v9 = vpack.c.bf16 %v1321_v1, %v1320_v0  ;;  %v2813_v0 = vpack.c.bf16 %v1347_v59, %v1346_v58 }
 0x309   :  { %1149 = vst.msk [vmem:[#allocation4 + $0x10] sm:$0xff] %vm411_vm5, %v1145_v8  ;;  %v1243_v8 = vld [vmem:[%s4036_s7 + $0x1b8] sm:$0xff]  ;;  %v2699_v10 = vpack.c.bf16 %v1225_v4, %v1224_v2  ;;  %v2797_v11 = vpack.c.bf16 %v1339_v6, %v1338_v5  ;;  %v1330_v1 = vld [vmem:[%s4036_s7 + $0x470] sm:$0xff]  ;;  %v1396_v6 = vld [vmem:[%s4036_s7 + $0x680] sm:$0xff] }
 0x30a   :  { %v1331_v2 = vld [vmem:[%s4036_s7 + $0x478] sm:$0xff]  ;;  %v1290_v58 = vld [vmem:[%s4036_s7 + $0x330] sm:$0xff] }
 0x30b   :  { %v1164_v12 = vld [vmem:[#allocation4 + $0x8] sm:$0x3]  ;;  %v1166_v13 = vld [vmem:[#allocation4 + $0xa] sm:$0x3]  ;;  %v1168_v14 = vld [vmem:[#allocation4 + $0xc] sm:$0x3] }
 0x30c   :  { %v1170_v15 = vld [vmem:[#allocation4 + $0xe] sm:$0x3]  ;;  %v1155_v16 = vld [vmem:[#allocation4] sm:$0x3]  ;;  %v1158_v17 = vld [vmem:[#allocation4 + $0x2] sm:$0x3] }
 0x30d   :  { %1165 = vst.msk [vmem:[#allocation5 + $0x8] sm:$0x3] %vm1156_vm3, %v1164_v12  ;;  %1167 = vst.msk [vmem:[#allocation5 + $0xa] sm:$0x3] %vm1156_vm3, %v1166_v13  ;;  %v1160_v18 = vld [vmem:[#allocation4 + $0x4] sm:$0x3] }
 0x30e   :  { %1169 = vst.msk [vmem:[#allocation5 + $0xc] sm:$0x3] %vm1156_vm3, %v1168_v14  ;;  %v1162_v19 = vld [vmem:[#allocation4 + $0x6] sm:$0x3]  ;;  %1171 = vst.msk [vmem:[#allocation5 + $0xe] sm:$0x3] %vm1156_vm3, %v1170_v15  ;;  %v2701_v15 = vpack.c.bf16 %v1243_v8, %v1242_v7 }
 0x30f   :  { %1157 = vst.msk [vmem:[#allocation5] sm:$0x3] %vm1156_vm3, %v1155_v16  ;;  %1159 = vst.msk [vmem:[#allocation5 + $0x2] sm:$0x3] %vm1156_vm3, %v1158_v17  ;;  %v1180_v22 = vld [vmem:[#allocation4 + $0x18] sm:$0x3] }
 0x310   :  { %1161 = vst.msk [vmem:[#allocation5 + $0x4] sm:$0x3] %vm1156_vm3, %v1160_v18  ;;  %1163 = vst.msk [vmem:[#allocation5 + $0x6] sm:$0x3] %vm1156_vm3, %v1162_v19  ;;  %v1182_v23 = vld [vmem:[#allocation4 + $0x1a] sm:$0x3] }
 0x311   :  { %v1172_v24 = vld [vmem:[#allocation4 + $0x10] sm:$0x3]  ;;  %v1174_v25 = vld [vmem:[#allocation4 + $0x12] sm:$0x3]  ;;  %v1176_v26 = vld [vmem:[#allocation4 + $0x14] sm:$0x3] }
 0x312   :  { %1181 = vst.msk [vmem:[#allocation5 + $0x18] sm:$0x3] %vm1156_vm3, %v1180_v22  ;;  %1183 = vst.msk [vmem:[#allocation5 + $0x1a] sm:$0x3] %vm1156_vm3, %v1182_v23  ;;  %v1178_v27 = vld [vmem:[#allocation4 + $0x16] sm:$0x3] }
 0x313   :  { %1173 = vst.msk [vmem:[#allocation5 + $0x10] sm:$0x3] %vm1156_vm3, %v1172_v24  ;;  %1175 = vst.msk [vmem:[#allocation5 + $0x12] sm:$0x3] %vm1156_vm3, %v1174_v25  ;;  %v1322_v12 = vld [vmem:[%s4036_s7 + $0x430] sm:$0xff]  ;;  %v1323_v13 = vld [vmem:[%s4036_s7 + $0x438] sm:$0xff] }
 0x314   :  { %1177 = vst.msk [vmem:[#allocation5 + $0x14] sm:$0x3] %vm1156_vm3, %v1176_v26  ;;  %1179 = vst.msk [vmem:[#allocation5 + $0x16] sm:$0x3] %vm1156_vm3, %v1178_v27  ;;  %v1226_v14 = vld [vmem:[%s4036_s7 + $0x130] sm:$0xff]  ;;  %v1227_v16 = vld [vmem:[%s4036_s7 + $0x138] sm:$0xff]  ;;  %v2799_v21 = vpack.c.bf16 %v1323_v13, %v1322_v12 }
 0x315   :  { %v3508_v30 = vld [vmem:[#allocation5 + $0x8] sm:$0xff]  ;;  %v1340_v17 = vld [vmem:[%s4036_s7 + $0x4c0] sm:$0xff]  ;;  %v2703_v22 = vpack.c.bf16 %v1227_v16, %v1226_v14  ;;  %v1235_v5 = vld [vmem:[%s4036_s7 + $0x178] sm:$0xff] }
 0x316   :  { %v1447_v33 = vrot.slane %v3508_v30, %v3499_v28  ;;  %v1341_v18 = vld [vmem:[%s4036_s7 + $0x4c8] sm:$0xff]  ;;  %v1244_v19 = vld [vmem:[%s4036_s7 + $0x1c0] sm:$0xff] }
 0x317   :  { %v1184_v34 = vld [vmem:[#allocation5] sm:$0xff]  ;;  %v2801_v23 = vpack.c.bf16 %v1341_v18, %v1340_v17  ;;  %v1325_v25 = vld [vmem:[%s4036_s7 + $0x448] sm:$0xff]  ;;  %v2705_v27 = vpack.c.bf16 %v1245_v20, %v1244_v19  ;;  %v1398_v18 = vld [vmem:[%s4036_s7 + $0x690] sm:$0xff] }
 0x318   :  { %v1430_v37 = vrot.slane %v1184_v34, %v3499_v28  ;;  %v1423_v38 = vcombine.high %v1184_v34, %v1184_v34  ;;  %v1455_v42 = vcombine.high %v1447_v33, %v1447_v33  ;;  %v1324_v24 = vld [vmem:[%s4036_s7 + $0x440] sm:$0xff]  ;;  %v1247_v34 = vld [vmem:[%s4036_s7 + $0x1d8] sm:$0xff]  ;;  %v1397_v7 = vld [vmem:[%s4036_s7 + $0x688] sm:$0xff] }
 0x319   :  { %v1228_v26 = vld [vmem:[%s4036_s7 + $0x140] sm:$0xff]  ;;  %v2803_v35 = vpack.c.bf16 %v1325_v25, %v1324_v24  ;;  %v2849_v13 = vpack.c.bf16 %v1397_v7, %v1396_v6  ;;  %v1399_v19 = vld [vmem:[%s4036_s7 + $0x698] sm:$0xff] }
 0x31a   :  { %v1438_v45 = vcombine.high %v1430_v37, %v1430_v37  ;;  %v3538_v47 = vrot.slane %v1423_v38, %v3499_v28  ;;  %1700 = vmatprep.mubr.f32.mxu1 %v1455_v42  ;;  %v2707_v36 = vpack.c.bf16 %v1229_v29, %v1228_v26  ;;  %v1326_v38 = vld [vmem:[%s4036_s7 + $0x450] sm:$0xff]  ;;  %v1231_v42 = vld [vmem:[%s4036_s7 + $0x158] sm:$0xff]  ;;  %v1300_v8 = vld [vmem:[%s4036_s7 + $0x380] sm:$0xff] }
 0x31b   :  { %v3549_v53 = vld [vmem:[#allocation5 + $0x10] sm:$0xff]  ;;  %1701 = vmatmul.mubr.f32.vlgmr.msra.gmra.mrb[8].mxu1 %v1447_v33  ;;  %v2807_v48 = vpack.c.bf16 %v1327_v39, %v1326_v38  ;;  %v2711_v49 = vpack.c.bf16 %v1231_v42, %v1230_v40  ;;  %v1380_v14 = vld [vmem:[%s4036_s7 + $0x600] sm:$0xff]  ;;  %v1303_v24 = vld [vmem:[%s4036_s7 + $0x398] sm:$0xff] }
 0x31c   :  { %1560 = vmatprep.mubr.f32.mxu0 %v1438_v45  ;;  %v1439_v56 = vcombine.high %v3538_v47, %v3538_v47  ;;  %v3561_v57 = vrot.slane %v3549_v53, %v3499_v28  ;;  %2788 = vmatpush3.bf16.msra.mxu1 %v2787_v43  ;;  %v1246_v33 = vld [vmem:[%s4036_s7 + $0x1d0] sm:$0xff]  ;;  %v1344_v43 = vld [vmem:[%s4036_s7 + $0x4e0] sm:$0xff]  ;;  %v1305_v38 = vld [vmem:[%s4036_s7 + $0x3a8] sm:$0xff] }
 0x31d   :  { %1561 = vmatmul.mubr.f32.vlgmr.msra.gmra.mrb[10].mxu0 %v1430_v37  ;;  %2790 = vmatprep.subr.bf16.mxu1 %v2789_v51  ;;  %v2805_v37 = vpack.c.bf16 %v1343_v32, %v1342_v31  ;;  %v2709_v41 = vpack.c.bf16 %v1247_v34, %v1246_v33  ;;  %v1248_v45 = vld [vmem:[%s4036_s7 + $0x1e0] sm:$0xff]  ;;  %v2809_v50 = vpack.c.bf16 %v1345_v44, %v1344_v43  ;;  %v1382_v26 = vld [vmem:[%s4036_s7 + $0x610] sm:$0xff]  ;;  %v1287_v32 = vld [vmem:[%s4036_s7 + $0x318] sm:$0xff] }
 0x31e   :  { %2692 = vmatpush3.bf16.msra.mxu0 %v2691_v46  ;;  %1630 = vmatprep.mubr.f32.mxu0 %v1439_v56  ;;  %v1472_v61 = vcombine.high %v3561_v57, %v3561_v57  ;;  %v1249_v46 = vld [vmem:[%s4036_s7 + $0x1e8] sm:$0xff]  ;;  %v1328_v51 = vld [vmem:[%s4036_s7 + $0x460] sm:$0xff]  ;;  %v1286_v29 = vld [vmem:[%s4036_s7 + $0x310] sm:$0xff]  ;;  %v2853_v31 = vpack.c.bf16 %v1399_v19, %v1398_v18 }
 0x31f   :  { %2694 = vmatprep.subr.bf16.mxu0 %v2693_v52  ;;  %v1329_v52 = vld [vmem:[%s4036_s7 + $0x468] sm:$0xff]  ;;  %v2713_v55 = vpack.c.bf16 %v1249_v46, %v1248_v45  ;;  %v1284_v17 = vld [vmem:[%s4036_s7 + $0x300] sm:$0xff]  ;;  %v1402_v46 = vld [vmem:[%s4036_s7 + $0x6b0] sm:$0xff] }
 0x320   :  { %1840 = vmatprep.mubr.f32.mxu1 %v1472_v61  ;;  %2792 = vmatpush3.bf16.msra.mxu1 %v2791_v60  ;;  %v1233_v56 = vld [vmem:[%s4036_s7 + $0x168] sm:$0xff]  ;;  %v1250_v60 = vld [vmem:[%s4036_s7 + $0x1f0] sm:$0xff]  ;;  %v1251_v61 = vld [vmem:[%s4036_s7 + $0x1f8] sm:$0xff] }
 0x321   :  { %2794 = vmatprep.subr.bf16.mxu1 %v2793_v63  ;;  %v2715_v63 = vpack.c.bf16 %v1233_v56, %v1232_v54  ;;  %v2717_v4 = vpack.c.bf16 %v1251_v61, %v1250_v60  ;;  %v1400_v33 = vld [vmem:[%s4036_s7 + $0x6a0] sm:$0xff]  ;;  %v1401_v34 = vld [vmem:[%s4036_s7 + $0x6a8] sm:$0xff]  ;;  %v1387_v56 = vld [vmem:[%s4036_s7 + $0x638] sm:$0xff] }
 0x322   :  { %2696 = vmatpush3.bf16.msra.mxu0 %v2695_v62  ;;  %v2811_v62 = vpack.c.bf16 %v1329_v52, %v1328_v51  ;;  %v1384_v42 = vld [vmem:[%s4036_s7 + $0x620] sm:$0xff]  ;;  %v1385_v43 = vld [vmem:[%s4036_s7 + $0x628] sm:$0xff]  ;;  %v1291_v60 = vld [vmem:[%s4036_s7 + $0x338] sm:$0xff] }
 0x323   :  { %2698 = vmatprep.subr.bf16.mxu0 %v2697_v3  ;;  %v1234_v3 = vld [vmem:[%s4036_s7 + $0x170] sm:$0xff]  ;;  %v1289_v45 = vld [vmem:[%s4036_s7 + $0x328] sm:$0xff]  ;;  %v2859_v51 = vpack.c.bf16 %v1385_v43, %v1384_v42  ;;  %v1404_v61 = vld [vmem:[%s4036_s7 + $0x6c0] sm:$0xff] }
 0x324   :  { %2796 = vmatpush3.bf16.msra.mxu1 %v2795_v9  ;;  %v1301_v9 = vld [vmem:[%s4036_s7 + $0x388] sm:$0xff]  ;;  %v2719_v12 = vpack.c.bf16 %v1235_v5, %v1234_v3  ;;  %v1292_v6 = vld [vmem:[%s4036_s7 + $0x340] sm:$0xff]  ;;  %v1295_v19 = vld [vmem:[%s4036_s7 + $0x358] sm:$0xff] }
 0x325   :  { %2798 = vmatprep.subr.bf16.mxu1 %v2797_v11  ;;  %v1440_v11 = vcombine.high %v3508_v30, %v3508_v30  ;;  %v2753_v16 = vpack.c.bf16 %v1301_v9, %v1300_v8  ;;  %v1285_v30 = vld [vmem:[%s4036_s7 + $0x308] sm:$0xff]  ;;  %v1406_v9 = vld [vmem:[%s4036_s7 + $0x6d0] sm:$0xff]  ;;  %v1395_v43 = vld [vmem:[%s4036_s7 + $0x678] sm:$0xff] }
 0x326   :  { %2700 = vmatpush3.bf16.msra.mxu0 %v2699_v10  ;;  %v2815_v10 = vpack.c.bf16 %v1331_v2, %v1330_v1  ;;  %v2755_v25 = vpack.c.bf16 %v1285_v30, %v1284_v17  ;;  %v2767_v2 = vpack.c.bf16 %v1291_v60, %v1290_v58  ;;  %v1389_v5 = vld [vmem:[%s4036_s7 + $0x648] sm:$0xff]  ;;  %v1391_v17 = vld [vmem:[%s4036_s7 + $0x658] sm:$0xff]  ;;  %v1294_v30 = vld [vmem:[%s4036_s7 + $0x350] sm:$0xff] }
 0x327   :  { %2702 = vmatprep.subr.bf16.mxu0 %v2701_v15  ;;  %v1381_v15 = vld [vmem:[%s4036_s7 + $0x608] sm:$0xff]  ;;  %v1394_v42 = vld [vmem:[%s4036_s7 + $0x670] sm:$0xff]  ;;  %v1367_v58 = vld [vmem:[%s4036_s7 + $0x598] sm:$0xff] }
 0x328   :  { %2800 = vmatpush3.bf16.msra.mxu1 %v2799_v21  ;;  %v2851_v20 = vpack.c.bf16 %v1381_v15, %v1380_v14  ;;  %v3735_v21 = vld.sshfl [vmem:[#allocation5 + $0x18] sm:$0x33 pattern:$0x76325410]  ;;  %v1293_v8 = vld [vmem:[%s4036_s7 + $0x348] sm:$0xff] }
 0x329   :  { %2802 = vmatprep.subr.bf16.mxu1 %v2801_v23  ;;  %v1302_v23 = vld [vmem:[%s4036_s7 + $0x390] sm:$0xff]  ;;  %v2771_v14 = vpack.c.bf16 %v1293_v8, %v1292_v6  ;;  %v1355_v8 = vld [vmem:[%s4036_s7 + $0x538] sm:$0xff] }
 0x32a   :  { %2704 = vmatpush3.bf16.msra.mxu0 %v2703_v22  ;;  %v3738_v22 = vrot.slane %v1440_v11, %v3499_v28  ;;  %v1310_v11 = vld [vmem:[%s4036_s7 + $0x3d0] sm:$0xff] }
 0x32b   :  { %2706 = vmatprep.subr.bf16.mxu0 %v2705_v27  ;;  %v1383_v27 = vld [vmem:[%s4036_s7 + $0x618] sm:$0xff] }
 0x32c   :  { %2804 = vmatpush3.bf16.msra.mxu1 %v2803_v35  ;;  %v1481_v35 = vcombine.high %v3735_v21, %v3735_v21  ;;  %v1456_v39 = vcombine.high %v3738_v22, %v3738_v22  ;;  %v2855_v40 = vpack.c.bf16 %v1383_v27, %v1382_v26  ;;  %v2775_v27 = vpack.c.bf16 %v1295_v19, %v1294_v30  ;;  %v1359_v19 = vld [vmem:[%s4036_s7 + $0x558] sm:$0xff] }
 0x32d   :  { %2806 = vmatprep.subr.bf16.mxu1 %v2805_v37  ;;  %v1304_v37 = vld [vmem:[%s4036_s7 + $0x3a0] sm:$0xff] }
 0x32e   :  { %2708 = vmatpush3.bf16.msra.mxu0 %v2707_v36  ;;  %v2757_v36 = vpack.c.bf16 %v1303_v24, %v1302_v23  ;;  %v2761_v44 = vpack.c.bf16 %v1305_v38, %v1304_v37  ;;  %v1409_v23 = vld [vmem:[%s4036_s7 + $0x6e8] sm:$0xff]  ;;  %v1312_v24 = vld [vmem:[%s4036_s7 + $0x3e0] sm:$0xff]  ;;  %v1411_v37 = vld [vmem:[%s4036_s7 + $0x6f8] sm:$0xff] }
 0x32f   :  { %2710 = vmatprep.subr.bf16.mxu0 %v2709_v41  ;;  %v2857_v41 = vpack.c.bf16 %v1401_v34, %v1400_v33  ;;  %v1296_v33 = vld [vmem:[%s4036_s7 + $0x360] sm:$0xff]  ;;  %v1314_v38 = vld [vmem:[%s4036_s7 + $0x3f0] sm:$0xff] }
 0x330   :  { %2808 = vmatpush3.bf16.msra.mxu1 %v2807_v48  ;;  %v1403_v48 = vld [vmem:[%s4036_s7 + $0x6b8] sm:$0xff] }
 0x331   :  { %2810 = vmatprep.subr.bf16.mxu1 %v2809_v50  ;;  %v1307_v50 = vld [vmem:[%s4036_s7 + $0x3b8] sm:$0xff]  ;;  %v2861_v54 = vpack.c.bf16 %v1403_v48, %v1402_v46  ;;  %v1364_v46 = vld [vmem:[%s4036_s7 + $0x580] sm:$0xff]  ;;  %v1365_v48 = vld [vmem:[%s4036_s7 + $0x588] sm:$0xff] }
 0x332   :  { %2712 = vmatpush3.bf16.msra.mxu0 %v2711_v49  ;;  %v1306_v49 = vld [vmem:[%s4036_s7 + $0x3b0] sm:$0xff] }
 0x333   :  { %2714 = vmatprep.subr.bf16.mxu0 %v2713_v55  ;;  %v1386_v55 = vld [vmem:[%s4036_s7 + $0x630] sm:$0xff]  ;;  %v2765_v59 = vpack.c.bf16 %v1307_v50, %v1306_v49  ;;  %v1457_v49 = vcombine.high %v3549_v53, %v3549_v53  ;;  %v2879_v50 = vpack.c.bf16 %v1395_v43, %v1394_v42  ;;  %v2083_v42 = vld [vmem:[%s4037_s8] ss:$0 sm:$0xff] }
 0x334   :  { %2812 = vmatpush3.bf16.msra.mxu1 %v2811_v62  ;;  %v1405_v62 = vld [vmem:[%s4036_s7 + $0x6c8] sm:$0xff]  ;;  %v2863_v1 = vpack.c.bf16 %v1387_v56, %v1386_v55  ;;  %v1366_v53 = vld [vmem:[%s4036_s7 + $0x590] sm:$0xff] }
 0x335   :  { %2814 = vmatprep.subr.bf16.mxu1 %v2813_v0  ;;  %v1309_v0 = vld [vmem:[%s4036_s7 + $0x3c8] sm:$0xff]  ;;  %v2865_v3 = vpack.c.bf16 %v1405_v62, %v1404_v61  ;;  %v3923_v56 = vrot.slane %v1457_v49, %v3499_v28  ;;  %v2821_v60 = vpack.c.bf16 %v1367_v58, %v1366_v53  ;;  %v1350_v61 = vld [vmem:[%s4036_s7 + $0x510] sm:$0xff]  ;;  %v1351_v28 = vld [vmem:[%s4036_s7 + $0x518] sm:$0xff] }
 0x336   :  { %2716 = vmatpush3.bf16.msra.mxu0 %v2715_v63  ;;  %v1308_v63 = vld [vmem:[%s4036_s7 + $0x3c0] sm:$0xff]  ;;  %v1349_v55 = vld [vmem:[%s4036_s7 + $0x508] sm:$0xff] }
 0x337   :  { %2718 = vmatprep.subr.bf16.mxu0 %v2717_v4  ;;  %v1388_v4 = vld [vmem:[%s4036_s7 + $0x640] sm:$0xff]  ;;  %v2769_v7 = vpack.c.bf16 %v1309_v0, %v1308_v63  ;;  %v1473_v62 = vcombine.high %v3923_v56, %v3923_v56  ;;  %v1369_v0 = vld [vmem:[%s4036_s7 + $0x5a8] sm:$0xff] }
 0x338   :  { %2816 = vmatpush3.bf16.msra.mxu1 %v2815_v10  ;;  %v1407_v10 = vld [vmem:[%s4036_s7 + $0x6d8] sm:$0xff]  ;;  %v1368_v63 = vld [vmem:[%s4036_s7 + $0x5a0] sm:$0xff] }
 0x339   :  { %2850 = vmatprep.subr.bf16.mxu1 %v2849_v13  ;;  %v2867_v13 = vpack.c.bf16 %v1389_v5, %v1388_v4  ;;  %v2869_v15 = vpack.c.bf16 %v1407_v10, %v1406_v9  ;;  %v1370_v4 = vld [vmem:[%s4036_s7 + $0x5b0] sm:$0xff]  ;;  %v1372_v9 = vld [vmem:[%s4036_s7 + $0x5c0] sm:$0xff]  ;;  %v1373_v10 = vld [vmem:[%s4036_s7 + $0x5c8] sm:$0xff] }
 0x33a   :  { %2720 = vmatpush3.bf16.msra.mxu0 %v2719_v12  ;;  %v1311_v12 = vld [vmem:[%s4036_s7 + $0x3d8] sm:$0xff] }
 0x33b   :  { %2754 = vmatprep.subr.bf16.mxu0 %v2753_v16  ;;  %1841 = vmatmul.mubr.f32.vlgmr.msra.gmra.mrb[10].mxu1 %v3561_v57  ;;  %v2759_v57 = vpack.c.bf16 %v1287_v32, %v1286_v29  ;;  %v1390_v16 = vld [vmem:[%s4036_s7 + $0x650] sm:$0xff]  ;;  %v2773_v18 = vpack.c.bf16 %v1311_v12, %v1310_v11  ;;  %v1393_v32 = vld [vmem:[%s4036_s7 + $0x668] sm:$0xff]  ;;  %v2833_v12 = vpack.c.bf16 %v1373_v10, %v1372_v9 }
 0x33c   :  { %2852 = vmatpush3.bf16.msra.mxu1 %v2851_v20  ;;  %1980 = vmatprep.mubr.f32.mxu1 %v1481_v35  ;;  %v1408_v20 = vld [vmem:[%s4036_s7 + $0x6e0] sm:$0xff]  ;;  %v2871_v26 = vpack.c.bf16 %v1391_v17, %v1390_v16  ;;  %v1297_v35 = vld [vmem:[%s4036_s7 + $0x368] sm:$0xff]  ;;  %v1375_v16 = vld [vmem:[%s4036_s7 + $0x5d8] sm:$0xff] }
 0x33d   :  { %1631 = vmatmul.mubr.f32.vlgmr.msra.gmra.mrb[12].mxu0 %v3538_v47  ;;  %v1288_v47 = vld [vmem:[%s4036_s7 + $0x320] sm:$0xff]  ;;  %2854 = vmatprep.subr.bf16.mxu1 %v2853_v31  ;;  %v2873_v29 = vpack.c.bf16 %v1409_v23, %v1408_v20  ;;  %v1377_v23 = vld [vmem:[%s4036_s7 + $0x5e8] sm:$0xff] }
 0x33e   :  { %2756 = vmatpush3.bf16.msra.mxu0 %v2755_v25  ;;  %1770 = vmatprep.mubr.f32.mxu0 %v1456_v39  ;;  %v2763_v52 = vpack.c.bf16 %v1289_v45, %v1288_v47  ;;  %v1313_v25 = vld [vmem:[%s4036_s7 + $0x3e8] sm:$0xff]  ;;  %v1392_v31 = vld [vmem:[%s4036_s7 + $0x660] sm:$0xff]  ;;  %v1315_v39 = vld [vmem:[%s4036_s7 + $0x3f8] sm:$0xff] }
 0x33f   :  { %2758 = vmatprep.subr.bf16.mxu0 %v2757_v36  ;;  %v2777_v34 = vpack.c.bf16 %v1313_v25, %v1312_v24  ;;  %v1410_v36 = vld [vmem:[%s4036_s7 + $0x6f0] sm:$0xff]  ;;  %v2781_v47 = vpack.c.bf16 %v1315_v39, %v1314_v38  ;;  %v1299_v45 = vld [vmem:[%s4036_s7 + $0x378] sm:$0xff]  ;;  %v1376_v20 = vld [vmem:[%s4036_s7 + $0x5e0] sm:$0xff] }
 0x340   :  { %2856 = vmatpush3.bf16.msra.mxu1 %v2855_v40  ;;  %v2875_v40 = vpack.c.bf16 %v1393_v32, %v1392_v31  ;;  %v2841_v25 = vpack.c.bf16 %v1377_v23, %v1376_v20  ;;  %v1379_v31 = vld [vmem:[%s4036_s7 + $0x5f8] sm:$0xff] }
 0x341   :  { %2858 = vmatprep.subr.bf16.mxu1 %v2857_v41  ;;  %v2877_v41 = vpack.c.bf16 %v1411_v37, %v1410_v36 }
 0x342   :  { %2760 = vmatpush3.bf16.msra.mxu0 %v2759_v57  ;;  %v2779_v57 = vpack.c.bf16 %v1297_v35, %v1296_v33  ;;  %v1363_v35 = vld [vmem:[%s4036_s7 + $0x578] sm:$0xff] }
 0x343   :  { %2762 = vmatprep.subr.bf16.mxu0 %v2761_v44  ;;  %v1298_v44 = vld [vmem:[%s4036_s7 + $0x370] sm:$0xff] }
 0x344   :  { %2860 = vmatpush3.bf16.msra.mxu1 %v2859_v51  ;;  %v2783_v51 = vpack.c.bf16 %v1299_v45, %v1298_v44 }
 0x345   :  { %2862 = vmatprep.subr.bf16.mxu1 %v2861_v54  ;;  %v1348_v54 = vld [vmem:[%s4036_s7 + $0x500] sm:$0xff] }
 0x346   :  { %2764 = vmatpush3.bf16.msra.mxu0 %v2763_v52  ;;  %v2817_v52 = vpack.c.bf16 %v1365_v48, %v1364_v46 }
 0x347   :  { %2766 = vmatprep.subr.bf16.mxu0 %v2765_v59  ;;  %v2819_v59 = vpack.c.bf16 %v1349_v55, %v1348_v54 }
 0x348   :  { %2864 = vmatpush3.bf16.msra.mxu1 %v2863_v1  ;;  %v2823_v1 = vpack.c.bf16 %v1351_v28, %v1350_v61 }
 0x349   :  { %2866 = vmatprep.subr.bf16.mxu1 %v2865_v3  ;;  %v1353_v3 = vld [vmem:[%s4036_s7 + $0x528] sm:$0xff] }
 0x34a   :  { %2768 = vmatpush3.bf16.msra.mxu0 %v2767_v2  ;;  %v2825_v2 = vpack.c.bf16 %v1369_v0, %v1368_v63 }
 0x34b   :  { %2770 = vmatprep.subr.bf16.mxu0 %v2769_v7  ;;  %v1354_v7 = vld [vmem:[%s4036_s7 + $0x530] sm:$0xff] }
 0x34c   :  { %2868 = vmatpush3.bf16.msra.mxu1 %v2867_v13  ;;  %v2831_v11 = vpack.c.bf16 %v1355_v8, %v1354_v7  ;;  %v1356_v13 = vld [vmem:[%s4036_s7 + $0x540] sm:$0xff] }
 0x34d   :  { %2870 = vmatprep.subr.bf16.mxu1 %v2869_v15  ;;  %v1374_v15 = vld [vmem:[%s4036_s7 + $0x5d0] sm:$0xff] }
 0x34e   :  { %2772 = vmatpush3.bf16.msra.mxu0 %v2771_v14  ;;  %v1357_v14 = vld [vmem:[%s4036_s7 + $0x548] sm:$0xff]  ;;  %v2837_v30 = vpack.c.bf16 %v1375_v16, %v1374_v15 }
 0x34f   :  { %2774 = vmatprep.subr.bf16.mxu0 %v2773_v18  ;;  %v2835_v17 = vpack.c.bf16 %v1357_v14, %v1356_v13  ;;  %v1358_v18 = vld [vmem:[%s4036_s7 + $0x550] sm:$0xff] }
 0x350   :  { %2872 = vmatpush3.bf16.msra.mxu1 %v2871_v26  ;;  %v2839_v24 = vpack.c.bf16 %v1359_v19, %v1358_v18  ;;  %v1360_v26 = vld [vmem:[%s4036_s7 + $0x560] sm:$0xff] }
 0x351   :  { %2874 = vmatprep.subr.bf16.mxu1 %v2873_v29  ;;  %v1378_v29 = vld [vmem:[%s4036_s7 + $0x5f0] sm:$0xff] }
 0x352   :  { %2776 = vmatpush3.bf16.msra.mxu0 %v2775_v27  ;;  %v1361_v27 = vld [vmem:[%s4036_s7 + $0x568] sm:$0xff]  ;;  %v2845_v33 = vpack.c.bf16 %v1379_v31, %v1378_v29 }
 0x353   :  { %2778 = vmatprep.subr.bf16.mxu0 %v2777_v34  ;;  %v2843_v32 = vpack.c.bf16 %v1361_v27, %v1360_v26  ;;  %v1362_v34 = vld [vmem:[%s4036_s7 + $0x570] sm:$0xff] }
 0x354   :  { %2876 = vmatpush3.bf16.msra.mxu1 %v2875_v40  ;;  %v2847_v36 = vpack.c.bf16 %v1363_v35, %v1362_v34 }
 0x355   :  { %2878 = vmatprep.subr.bf16.mxu1 %v2877_v41 }
 0x356   :  { %2780 = vmatpush3.bf16.msra.mxu0 %v2779_v57 }
 0x357   :  { %2782 = vmatprep.subr.bf16.mxu0 %v2781_v47 }
 0x358   :  { %2880 = vmatpush3.bf16.msra.mxu1 %v2879_v50 }
 0x35a   :  { %2784 = vmatpush3.bf16.msra.mxu0 %v2783_v51 }
 0x35b   :  { %2818 = vmatprep.subr.bf16.mxu0 %v2817_v52  ;;  %1981 = vmatmul.mubr.f32.vlgmr.msra.gmra.mrb[12].mxu1 %v3735_v21  ;;  %v1352_v21 = vld [vmem:[%s4036_s7 + $0x520] sm:$0xff] }
 0x35c   :  { %v2827_v5 = vpack.c.bf16 %v1353_v3, %v1352_v21 }
 0x35d   :  { %1771 = vmatmul.mubr.f32.vlgmr.msra.gmra.mrb[14].mxu0 %v3738_v22  ;;  %v1371_v22 = vld [vmem:[%s4036_s7 + $0x5b8] sm:$0xff]  ;;  %s2963_s7 = smov [#allocation6]  }
 0x35e   :  { %2820 = vmatpush3.bf16.msra.mxu0 %v2819_v59  ;;  %1910 = vmatprep.mubr.f32.mxu0 %v1473_v62  ;;  %v2829_v6 = vpack.c.bf16 %v1371_v22, %v1370_v4  ;;  %s1994_s8 = sshll.u32 %s2963_s7, 4  ;;  %s1995_s8 = int_to_ptr.vmem [resolvable:$true] %s1994_s8 }
 0x35f   :  { %2822 = vmatprep.subr.bf16.mxu0 %v2821_v60  ;;  %s2936_s20 = scalar_lea.vmem %s1995_s8, 32  ;;  %p2941_p1 = scmp.lt.s32.totalorder %s1995_s8, %s1995_s8 }
 0x360   :  { %p2937_p0 = scmp.ne.s32.totalorder %s1995_s8, %s2936_s20  ;;  %p2942_p2 = scmp.lt.s32.totalorder %s2936_s20, %s2936_s20 }
 0x362   :  { %2824 = vmatpush3.bf16.msra.mxu0 %v2823_v1  ;;  %p2943_p3 = por %p2942_p2, %p2941_p1 }
 0x363   :  { %2826 = vmatprep.subr.bf16.mxu0 %v2825_v2 }
 0x364   :  { %p2944_p4 = pnand %p2943_p3, %p2937_p0 }
 0x366   :  { %2828 = vmatpush3.bf16.msra.mxu0 %v2827_v5 }
 0x367   :  { %2830 = vmatprep.subr.bf16.mxu0 %v2829_v6 }
 0x36a   :  { %2832 = vmatpush3.bf16.msra.mxu0 %v2831_v11 }
 0x36b   :  { %2834 = vmatprep.subr.bf16.mxu0 %v2833_v12 }
 0x36e   :  { %2836 = vmatpush3.bf16.msra.mxu0 %v2835_v17 }
 0x36f   :  { %2838 = vmatprep.subr.bf16.mxu0 %v2837_v30 }
 0x372   :  { %2840 = vmatpush3.bf16.msra.mxu0 %v2839_v24 }
 0x373   :  { %2842 = vmatprep.subr.bf16.mxu0 %v2841_v25 }
 0x376   :  { %2844 = vmatpush3.bf16.msra.mxu0 %v2843_v32 }
 0x377   :  { %2846 = vmatprep.subr.bf16.mxu0 %v2845_v33 }
 0x37a   :  { %2848 = vmatpush3.bf16.msra.mxu0 %v2847_v36 }
 0x37d   :  { %1911 = vmatmul.mubr.f32.vlgmr.msra.gmra.mrb[16].mxu0 %v3923_v56 }
 0x3ee   :  { %v2271_v37 = vpop.f32.mrb[8].mxu1 }
 0x3ef   :  { %v2272_v39 = vpop.f32.mrb[9].mxu1 }
 0x3f0   :  { %v2201_v38 = vpop.f32.mrb[10].mxu0  ;;  %v2273_v40 = vadd.f32 %v2272_v39, %v2271_v37 }
 0x3f1   :  { %v2202_v57 = vpop.f32.mrb[11].mxu0 }
 0x3f2   :  { %v2203_v41 = vadd.f32 %v2202_v57, %v2201_v38 }
 0x3f4   :  { %v1563_v48 = vadd.f32 %v2203_v41, %v2083_v42 }
 0x40e   :  { %v2341_v43 = vpop.f32.mrb[10].mxu1 }
 0x40f   :  { %v2342_v44 = vpop.f32.mrb[11].mxu1 }
 0x410   :  { %v2236_v47 = vpop.f32.mrb[12].mxu0  ;;  %v2343_v45 = vadd.f32 %v2342_v44, %v2341_v43 }
 0x411   :  { %v2237_v46 = vpop.f32.mrb[13].mxu0 }
 0x412   :  { %v2238_v49 = vadd.f32 %v2237_v46, %v2236_v47 }
 0x414   :  { %v1633_v50 = vadd.f32 %v2238_v49, %v1563_v48 }
 0x416   :  { %v1703_v51 = vadd.f32 %v2273_v40, %v1633_v50 }
 0x42e   :  { %v2411_v52 = vpop.f32.mrb[12].mxu1 }
 0x42f   :  { %v2412_v55 = vpop.f32.mrb[13].mxu1 }
 0x430   :  { %v2306_v54 = vpop.f32.mrb[14].mxu0  ;;  %v2413_v56 = vadd.f32 %v2412_v55, %v2411_v52 }
 0x431   :  { %v2307_v53 = vpop.f32.mrb[15].mxu0 }
 0x432   :  { %v2308_v58 = vadd.f32 %v2307_v53, %v2306_v54 }
 0x434   :  { %v1773_v59 = vadd.f32 %v2308_v58, %v1703_v51 }
 0x436   :  { %v1843_v60 = vadd.f32 %v2343_v45, %v1773_v59 }
 0x450   :  { %v2376_v61 = vpop.f32.mrb[16].mxu0 }
 0x451   :  { %v2377_v28 = vpop.f32.mrb[17].mxu0 }
 0x452   :  { %v2378_v62 = vadd.f32 %v2377_v28, %v2376_v61 }
 0x454   :  { %v1913_v63 = vadd.f32 %v2378_v62, %v1843_v60 }
 0x456   :  { %v1983_v0 = vadd.f32 %v2413_v56, %v1913_v63 }
 0x458   :  { %1987 = vst.msk [vmem:[#allocation6] sm:$0x3] %vm1986_vm4, %v1983_v0 }
 0x459   :  { %2947 = shalt.err (!%p2944_p4)
}
 0x45a   :  { %s2948_s22 = scalar_lea.hbm %s4038_s9, 32 }
 0x45b   :  { %p2949_p5 = scmp.ne.s32.totalorder %s4038_s9, %s2948_s22  ;;  %p2952_p6 = scmp.lt.u32.totalorder %s2948_s22, %s4038_s9 }
 0x45d   :  { %p2954_p7 = pnand %p2952_p6, %p2949_p5 }
 0x45f   :  { %2957 = shalt.err (!%p2954_p7)
}
 0x460   :  { %1997 = dma.vmem_to_hbm [thread:$0]  %s1995_s8, 32, %s4038_s9, [#allocation7]  }
 0x461   :  { %2958 = dma.done.wait [#allocation7], 32  }
 0x462   :  { %2959 = vsyncadd [#allocation7], 4294967264 }
 0x463   :  { %2001 = vsyncpa [#allocation7], 1 }

</bundles_post_ra>
